<compile_context>
chip_gen: v5e
topology: v5e:2x2
jax: 0.10.0
libtpu: 0.0.40
codegen_flags: <defaults>
</compile_context>

<pallas_src>
import jax
import jax.numpy as jnp
from jax.experimental import pallas as pl
from jax.experimental.pallas import tpu as pltpu

EPS = 1e-5


# ---------------------------------------------------------------------------
# Kernels
# ---------------------------------------------------------------------------
def _layer_norm_f32(x, w, b):
    mu = jnp.mean(x, axis=-1, keepdims=True)
    xc = x - mu
    var = jnp.mean(xc * xc, axis=-1, keepdims=True)
    return xc * jax.lax.rsqrt(var + EPS) * w + b


def _block_body(res,
                n1w_ref, n1b_ref,
                wmix_ref, bmix_ref,
                n2w_ref, n2b_ref,
                wfc1_ref, bfc1_ref,
                wfc2_ref, bfc2_ref,
                hout_ref, rout_ref):
    # res: fp32 [tm, D]   (residual_in_fp32=True)

    # ---- LayerNorm #1 (self.norm), fp32 ----
    hn = _layer_norm_f32(res, n1w_ref[...], n1b_ref[...])

    # ---- mixer: linear projection; bf16 MXU inputs, fp32 accumulation ----
    mix = jnp.dot(hn.astype(jnp.bfloat16), wmix_ref[...],
                  preferred_element_type=jnp.float32) + bmix_ref[...]

    # ---- residual add #2 (kept fp32) + LayerNorm #2 (self.norm2) ----
    res2 = mix + res
    hn2 = _layer_norm_f32(res2, n2w_ref[...], n2b_ref[...])

    # ---- MLP: Linear -> GELU(tanh) -> Linear; bf16 MXU inputs, fp32 acc ----
    z = jnp.dot(hn2.astype(jnp.bfloat16), wfc1_ref[...],
                preferred_element_type=jnp.float32) + bfc1_ref[...]
    z = jax.nn.gelu(z, approximate=True)
    out = jnp.dot(z.astype(jnp.bfloat16), wfc2_ref[...],
                  preferred_element_type=jnp.float32) + bfc2_ref[...]

    hout_ref[...] = out.astype(hout_ref.dtype)
    rout_ref[...] = res2            # residual_in_fp32=True -> fp32 residual out


def block_kernel(h_ref, r_ref, *rest):
    res = h_ref[...].astype(jnp.float32) + r_ref[...].astype(jnp.float32)
    _block_body(res, *rest)


def block_kernel_no_residual(h_ref, *rest):
    # residual is None -> residual = hidden_states (skip the zeros-tensor DMA)
    res = h_ref[...].astype(jnp.float32)
    _block_body(res, *rest)


# ---------------------------------------------------------------------------
# Wrapper
# ---------------------------------------------------------------------------
def _round_up(x, m):
    return ((x + m - 1) // m) * m


def block_forward(hidden, residual, params, *, tm=256):
    """hidden: [M, D]; residual: [M, D] or None.

    Returns (hidden_out[M, D], residual_out[M, D] fp32, dual_loss)."""
    M, D = hidden.shape
    H = params["wfc1"].shape[1]
    assert D % 128 == 0 and H % 128 == 0, "feature dims must be lane-dense (x128)"

    # Token tile: as large as useful (MXU rows / per-step overhead), but no
    # larger than the (sublane-rounded) problem; multiple of 8 sublanes.
    tm = max(8, min(tm, _round_up(M, 8)))
    Mp = _round_up(M, tm)
    pad = Mp - M
    if pad:
        hidden = jnp.pad(hidden, ((0, pad), (0, 0)))
        if residual is not None:
            residual = jnp.pad(residual, ((0, pad), (0, 0)))

    tok_spec = pl.BlockSpec((tm, D), lambda i: (i, 0))

    weight_args = (
        params["norm_w"], params["norm_b"],
        params["wmix"].astype(jnp.bfloat16), params["bmix"],
        params["norm2_w"], params["norm2_b"],
        params["wfc1"].astype(jnp.bfloat16), params["bfc1"],
        params["wfc2"].astype(jnp.bfloat16), params["bfc2"],
    )
    weight_shapes = [(1, D), (1, D),
                     (D, D), (1, D),
                     (1, D), (1, D),
                     (D, H), (1, H),
                     (H, D), (1, D)]

    # VMEM budget: single-buffered bf16 weights + fp32 biases/norm params,
    # double-buffered activation tiles, headroom for the [tm, H] intermediates.
    weight_bytes = 2 * (D * D + 2 * D * H) + 4 * (6 * D + H)
    n_resid_in = 2 if residual is not None else 1
    act_bytes = (2 * n_resid_in * tm * D * 4          # inputs, double-buffered
                 + 2 * tm * D * hidden.dtype.itemsize  # hidden out
                 + 2 * tm * D * 4)                     # fp32 residual out
    scratch_bytes = 4 * tm * H * 4
    vmem_limit = min(
        max(int(1.25 * (weight_bytes + act_bytes + scratch_bytes)) + (4 << 20),
            32 << 20),
        64 << 20)  # stay within v7x physical VMEM; plenty for v5e/v6e too

    kernel = block_kernel if residual is not None else block_kernel_no_residual
    inputs = ((hidden, residual) if residual is not None else (hidden,)) + weight_args

    def _run(single_buffer_weights):
        def w_spec(shape):
            idx = lambda i, _n=len(shape): (0,) * _n
            if single_buffer_weights:
                # index_map is constant across the grid -> one resident buffer.
                return pl.BlockSpec(shape, idx, pipeline_mode=pl.Buffered(1))
            return pl.BlockSpec(shape, idx)

        tok_specs = [tok_spec] * n_resid_in
        return pl.pallas_call(
            kernel,
            out_shape=(jax.ShapeDtypeStruct((Mp, D), hidden.dtype),
                       jax.ShapeDtypeStruct((Mp, D), jnp.float32)),
            grid_spec=pltpu.PrefetchScalarGridSpec(
                num_scalar_prefetch=0,
                grid=(Mp // tm,),
                in_specs=tok_specs + [w_spec(s) for s in weight_shapes],
                out_specs=(tok_spec, tok_spec)),
            compiler_params=pltpu.CompilerParams(
                dimension_semantics=("parallel",),
                vmem_limit_bytes=vmem_limit),
        )(*inputs)

    try:
        hout, rout = _run(single_buffer_weights=True)
    except Exception:
        # Fallback: identical semantics with default (double-buffered) weights.
        hout, rout = _run(single_buffer_weights=False)

    if pad:
        hout = hout[:M]
        rout = rout[:M]

    # TODO(synk): dual_loss semantics come from the abstract mixer_cls; the
    # concrete linear mixer used here has no auxiliary loss, so it is 0.0.
    dual_loss = jnp.float32(0.0)
    return hout, rout, dual_loss


# ---------------------------------------------------------------------------
# Pure-JAX reference (fp32, matches the PyTorch forward, fused_add_norm=False)
# ---------------------------------------------------------------------------
def block_ref(hidden, residual, p):
    res = hidden.astype(jnp.float32)
    if residual is not None:
        res = res + residual.astype(jnp.float32)

    def ln(x, w, b):
        mu = x.mean(-1, keepdims=True)
        var = ((x - mu) ** 2).mean(-1, keepdims=True)
        return (x - mu) * jax.lax.rsqrt(var + EPS) * w + b

    hn = ln(res, p["norm_w"], p["norm_b"])
    mix = hn @ p["wmix"] + p["bmix"]
    res2 = mix + res
    hn2 = ln(res2, p["norm2_w"], p["norm2_b"])
    z = jax.nn.gelu(hn2 @ p["wfc1"] + p["bfc1"], approximate=True)
    out = z @ p["wfc2"] + p["bfc2"]
    return out, res2


def make_params(key, dim, hidden_mult=4):
    H = hidden_mult * dim
    k = jax.random.split(key, 8)
    return {
        # slightly perturbed LayerNorm affine so the kernel's w/b paths are tested
        "norm_w": 1.0 + 0.1 * jax.random.normal(k[0], (1, dim), jnp.float32),
        "norm_b": 0.1 * jax.random.normal(k[1], (1, dim), jnp.float32),
        "norm2_w": 1.0 + 0.1 * jax.random.normal(k[2], (1, dim), jnp.float32),
        "norm2_b": 0.1 * jax.random.normal(k[3], (1, dim), jnp.float32),
        # mixer linear
        "wmix": 0.02 * jax.random.normal(k[4], (dim, dim), jnp.float32),
        "bmix": 0.02 * jax.random.normal(k[5], (1, dim), jnp.float32),
        # MLP
        "wfc1": 0.02 * jax.random.normal(k[6], (dim, H), jnp.float32),
        "bfc1": jnp.zeros((1, H), jnp.float32),
        "wfc2": 0.02 * jax.random.normal(k[7], (H, dim), jnp.float32),
        "bfc2": jnp.zeros((1, dim), jnp.float32),
    }


if __name__ == "__main__":
    # Small shapes, but feature dims lane-dense: batch=2, seq=8, dim=128, H=512.
    B, L, D = 2, 8, 128
    M = B * L

    key = jax.random.PRNGKey(0)
    kp, kh, kr = jax.random.split(key, 3)
    params = make_params(kp, D)

    hidden = jax.random.normal(kh, (B, L, D), jnp.float32)
    residual = jax.random.normal(kr, (B, L, D), jnp.float32)

    h2d = hidden.reshape(M, D)
    r2d = residual.reshape(M, D)

    hout, rout, dual_loss = block_forward(h2d, r2d, params, tm=256)
    hout = jax.block_until_ready(hout)
    rout = jax.block_until_ready(rout)

    # verify against pure-JAX fp32 reference (kernel matmuls use bf16 inputs
    # with fp32 accumulation -> moderate tolerance)
    h_ref, r_ref = block_ref(h2d, r2d, params)
    assert jnp.allclose(hout, h_ref, atol=2e-2, rtol=2e-2), "hidden mismatch"
    assert jnp.allclose(rout, r_ref, atol=2e-2, rtol=2e-2), "residual mismatch"

    # residual=None path (first block in a stack): no zeros-tensor DMA
    h0, r0, _ = block_forward(h2d, None, params, tm=256)
    h0 = jax.block_until_ready(h0)
    h0_ref, r0_ref = block_ref(h2d, None, params)
    assert jnp.allclose(h0, h0_ref, atol=2e-2, rtol=2e-2)
    assert jnp.allclose(r0, r0_ref, atol=2e-2, rtol=2e-2)

    # outputs reshape back to [B, L, D] for the caller
    _ = hout.reshape(B, L, D), rout.reshape(B, L, D)

    print("KERNEL_OK")
</pallas_src>

<mosaic_0001>
module attributes {stable_mosaic.version = 11 : i64} {
  func.func @block_kernel(%arg0: i32, %arg1: memref<16x128xf32, #tpu.memory_space<vmem>>, %arg2: memref<16x128xf32, #tpu.memory_space<vmem>>, %arg3: memref<1x128xf32, #tpu.memory_space<vmem>>, %arg4: memref<1x128xf32, #tpu.memory_space<vmem>>, %arg5: memref<128x128xbf16, #tpu.memory_space<vmem>>, %arg6: memref<1x128xf32, #tpu.memory_space<vmem>>, %arg7: memref<1x128xf32, #tpu.memory_space<vmem>>, %arg8: memref<1x128xf32, #tpu.memory_space<vmem>>, %arg9: memref<128x512xbf16, #tpu.memory_space<vmem>>, %arg10: memref<1x512xf32, #tpu.memory_space<vmem>>, %arg11: memref<512x128xbf16, #tpu.memory_space<vmem>>, %arg12: memref<1x128xf32, #tpu.memory_space<vmem>>, %arg13: memref<16x128xf32, #tpu.memory_space<vmem>>, %arg14: memref<16x128xf32, #tpu.memory_space<vmem>>) attributes {dimension_semantics = [#tpu.dimension_semantics<parallel>], iteration_bounds = array<i64: 1>, scalar_prefetch = 0 : i64, scratch_operands = 0 : i64, tpu.core_type = #tpu.core_type<tc>, window_params = [{transform_indices = @transform_0, window_bounds = array<i64: 16, 128>}, {transform_indices = @transform_1, window_bounds = array<i64: 16, 128>}, {pipeline_mode = #tpu.pipeline_mode<synchronous>, transform_indices = @transform_2, window_bounds = array<i64: 1, 128>}, {pipeline_mode = #tpu.pipeline_mode<synchronous>, transform_indices = @transform_3, window_bounds = array<i64: 1, 128>}, {pipeline_mode = #tpu.pipeline_mode<synchronous>, transform_indices = @transform_4, window_bounds = array<i64: 128, 128>}, {pipeline_mode = #tpu.pipeline_mode<synchronous>, transform_indices = @transform_5, window_bounds = array<i64: 1, 128>}, {pipeline_mode = #tpu.pipeline_mode<synchronous>, transform_indices = @transform_6, window_bounds = array<i64: 1, 128>}, {pipeline_mode = #tpu.pipeline_mode<synchronous>, transform_indices = @transform_7, window_bounds = array<i64: 1, 128>}, {pipeline_mode = #tpu.pipeline_mode<synchronous>, transform_indices = @transform_8, window_bounds = array<i64: 128, 512>}, {pipeline_mode = #tpu.pipeline_mode<synchronous>, transform_indices = @transform_9, window_bounds = array<i64: 1, 512>}, {pipeline_mode = #tpu.pipeline_mode<synchronous>, transform_indices = @transform_10, window_bounds = array<i64: 512, 128>}, {pipeline_mode = #tpu.pipeline_mode<synchronous>, transform_indices = @transform_11, window_bounds = array<i64: 1, 128>}, {transform_indices = @transform_12, window_bounds = array<i64: 16, 128>}, {transform_indices = @transform_13, window_bounds = array<i64: 16, 128>}]} {
    %c0 = arith.constant 0 : index
    %c0_0 = arith.constant 0 : index
    %0 = vector.load %arg1[%c0, %c0_0] : memref<16x128xf32, #tpu.memory_space<vmem>>, vector<16x128xf32>
    %c0_1 = arith.constant 0 : index
    %c0_2 = arith.constant 0 : index
    %1 = vector.load %arg2[%c0_1, %c0_2] : memref<16x128xf32, #tpu.memory_space<vmem>>, vector<16x128xf32>
    %2 = arith.addf %0, %1 : vector<16x128xf32>
    %c0_3 = arith.constant 0 : index
    %c0_4 = arith.constant 0 : index
    %3 = vector.load %arg3[%c0_3, %c0_4] : memref<1x128xf32, #tpu.memory_space<vmem>>, vector<1x128xf32>
    %c0_5 = arith.constant 0 : index
    %c0_6 = arith.constant 0 : index
    %4 = vector.load %arg4[%c0_5, %c0_6] : memref<1x128xf32, #tpu.memory_space<vmem>>, vector<1x128xf32>
    %cst = arith.constant dense<0.000000e+00> : vector<16xf32>
    %5 = vector.multi_reduction <add>, %2, %cst [1] : vector<16x128xf32> to vector<16xf32>
    %6 = vector.shape_cast %5 : vector<16xf32> to vector<16x1xf32>
    %cst_7 = arith.constant 1.280000e+02 : f32
    %7 = vector.broadcast %cst_7 : f32 to vector<16x1xf32>
    %8 = arith.divf %6, %7 : vector<16x1xf32>
    %9 = vector.broadcast %8 : vector<16x1xf32> to vector<16x128xf32>
    %10 = arith.subf %2, %9 : vector<16x128xf32>
    %11 = arith.mulf %10, %10 : vector<16x128xf32>
    %cst_8 = arith.constant dense<0.000000e+00> : vector<16xf32>
    %12 = vector.multi_reduction <add>, %11, %cst_8 [1] : vector<16x128xf32> to vector<16xf32>
    %13 = vector.shape_cast %12 : vector<16xf32> to vector<16x1xf32>
    %cst_9 = arith.constant 1.280000e+02 : f32
    %14 = vector.broadcast %cst_9 : f32 to vector<16x1xf32>
    %15 = arith.divf %13, %14 : vector<16x1xf32>
    %cst_10 = arith.constant 9.99999974E-6 : f32
    %16 = vector.broadcast %cst_10 : f32 to vector<16x1xf32>
    %17 = arith.addf %15, %16 : vector<16x1xf32>
    %18 = math.rsqrt %17 : vector<16x1xf32>
    %19 = vector.broadcast %18 : vector<16x1xf32> to vector<16x128xf32>
    %20 = arith.mulf %10, %19 : vector<16x128xf32>
    %21 = vector.broadcast %3 : vector<1x128xf32> to vector<16x128xf32>
    %22 = arith.mulf %20, %21 : vector<16x128xf32>
    %23 = vector.broadcast %4 : vector<1x128xf32> to vector<16x128xf32>
    %24 = arith.addf %22, %23 : vector<16x128xf32>
    %25 = arith.truncf %24 : vector<16x128xf32> to vector<16x128xbf16>
    %c0_11 = arith.constant 0 : index
    %c0_12 = arith.constant 0 : index
    %26 = vector.load %arg5[%c0_11, %c0_12] : memref<128x128xbf16, #tpu.memory_space<vmem>>, vector<128x128xbf16>
    %cst_13 = arith.constant dense<0.000000e+00> : vector<16x128xf32>
    %27 = tpu.matmul %25, %26, %cst_13 {dimension_numbers = #tpu.dot_dimension_numbers<[1], [0], [0], [1], [0, 0, 1, 1], [], []>} : vector<16x128xbf16>, vector<128x128xbf16>, vector<16x128xf32> -> vector<16x128xf32>
    %c0_14 = arith.constant 0 : index
    %c0_15 = arith.constant 0 : index
    %28 = vector.load %arg6[%c0_14, %c0_15] : memref<1x128xf32, #tpu.memory_space<vmem>>, vector<1x128xf32>
    %29 = vector.broadcast %28 : vector<1x128xf32> to vector<16x128xf32>
    %30 = arith.addf %27, %29 : vector<16x128xf32>
    %31 = arith.addf %30, %2 : vector<16x128xf32>
    %c0_16 = arith.constant 0 : index
    %c0_17 = arith.constant 0 : index
    %32 = vector.load %arg7[%c0_16, %c0_17] : memref<1x128xf32, #tpu.memory_space<vmem>>, vector<1x128xf32>
    %c0_18 = arith.constant 0 : index
    %c0_19 = arith.constant 0 : index
    %33 = vector.load %arg8[%c0_18, %c0_19] : memref<1x128xf32, #tpu.memory_space<vmem>>, vector<1x128xf32>
    %cst_20 = arith.constant dense<0.000000e+00> : vector<16xf32>
    %34 = vector.multi_reduction <add>, %31, %cst_20 [1] : vector<16x128xf32> to vector<16xf32>
    %35 = vector.shape_cast %34 : vector<16xf32> to vector<16x1xf32>
    %cst_21 = arith.constant 1.280000e+02 : f32
    %36 = vector.broadcast %cst_21 : f32 to vector<16x1xf32>
    %37 = arith.divf %35, %36 : vector<16x1xf32>
    %38 = vector.broadcast %37 : vector<16x1xf32> to vector<16x128xf32>
    %39 = arith.subf %31, %38 : vector<16x128xf32>
    %40 = arith.mulf %39, %39 : vector<16x128xf32>
    %cst_22 = arith.constant dense<0.000000e+00> : vector<16xf32>
    %41 = vector.multi_reduction <add>, %40, %cst_22 [1] : vector<16x128xf32> to vector<16xf32>
    %42 = vector.shape_cast %41 : vector<16xf32> to vector<16x1xf32>
    %cst_23 = arith.constant 1.280000e+02 : f32
    %43 = vector.broadcast %cst_23 : f32 to vector<16x1xf32>
    %44 = arith.divf %42, %43 : vector<16x1xf32>
    %cst_24 = arith.constant 9.99999974E-6 : f32
    %45 = vector.broadcast %cst_24 : f32 to vector<16x1xf32>
    %46 = arith.addf %44, %45 : vector<16x1xf32>
    %47 = math.rsqrt %46 : vector<16x1xf32>
    %48 = vector.broadcast %47 : vector<16x1xf32> to vector<16x128xf32>
    %49 = arith.mulf %39, %48 : vector<16x128xf32>
    %50 = vector.broadcast %32 : vector<1x128xf32> to vector<16x128xf32>
    %51 = arith.mulf %49, %50 : vector<16x128xf32>
    %52 = vector.broadcast %33 : vector<1x128xf32> to vector<16x128xf32>
    %53 = arith.addf %51, %52 : vector<16x128xf32>
    %54 = arith.truncf %53 : vector<16x128xf32> to vector<16x128xbf16>
    %c0_25 = arith.constant 0 : index
    %c0_26 = arith.constant 0 : index
    %55 = vector.load %arg9[%c0_25, %c0_26] : memref<128x512xbf16, #tpu.memory_space<vmem>>, vector<128x512xbf16>
    %cst_27 = arith.constant dense<0.000000e+00> : vector<16x512xf32>
    %56 = tpu.matmul %54, %55, %cst_27 {dimension_numbers = #tpu.dot_dimension_numbers<[1], [0], [0], [1], [0, 0, 1, 1], [], []>} : vector<16x128xbf16>, vector<128x512xbf16>, vector<16x512xf32> -> vector<16x512xf32>
    %c0_28 = arith.constant 0 : index
    %c0_29 = arith.constant 0 : index
    %57 = vector.load %arg10[%c0_28, %c0_29] : memref<1x512xf32, #tpu.memory_space<vmem>>, vector<1x512xf32>
    %58 = vector.broadcast %57 : vector<1x512xf32> to vector<16x512xf32>
    %59 = arith.addf %56, %58 : vector<16x512xf32>
    %60 = arith.mulf %59, %59 : vector<16x512xf32>
    %61 = arith.mulf %59, %60 : vector<16x512xf32>
    %cst_30 = arith.constant 4.471500e-02 : f32
    %62 = vector.broadcast %cst_30 : f32 to vector<16x512xf32>
    %63 = arith.mulf %62, %61 : vector<16x512xf32>
    %64 = arith.addf %59, %63 : vector<16x512xf32>
    %cst_31 = arith.constant 0.797884583 : f32
    %65 = vector.broadcast %cst_31 : f32 to vector<16x512xf32>
    %66 = arith.mulf %65, %64 : vector<16x512xf32>
    %67 = math.tanh %66 : vector<16x512xf32>
    %cst_32 = arith.constant 1.000000e+00 : f32
    %68 = vector.broadcast %cst_32 : f32 to vector<16x512xf32>
    %69 = arith.addf %68, %67 : vector<16x512xf32>
    %cst_33 = arith.constant 5.000000e-01 : f32
    %70 = vector.broadcast %cst_33 : f32 to vector<16x512xf32>
    %71 = arith.mulf %70, %69 : vector<16x512xf32>
    %72 = arith.mulf %59, %71 : vector<16x512xf32>
    %73 = arith.truncf %72 : vector<16x512xf32> to vector<16x512xbf16>
    %c0_34 = arith.constant 0 : index
    %c0_35 = arith.constant 0 : index
    %74 = vector.load %arg11[%c0_34, %c0_35] : memref<512x128xbf16, #tpu.memory_space<vmem>>, vector<512x128xbf16>
    %cst_36 = arith.constant dense<0.000000e+00> : vector<16x128xf32>
    %75 = tpu.matmul %73, %74, %cst_36 {dimension_numbers = #tpu.dot_dimension_numbers<[1], [0], [0], [1], [0, 0, 1, 1], [], []>} : vector<16x512xbf16>, vector<512x128xbf16>, vector<16x128xf32> -> vector<16x128xf32>
    %c0_37 = arith.constant 0 : index
    %c0_38 = arith.constant 0 : index
    %76 = vector.load %arg12[%c0_37, %c0_38] : memref<1x128xf32, #tpu.memory_space<vmem>>, vector<1x128xf32>
    %77 = vector.broadcast %76 : vector<1x128xf32> to vector<16x128xf32>
    %78 = arith.addf %75, %77 : vector<16x128xf32>
    %c0_39 = arith.constant 0 : index
    %c0_40 = arith.constant 0 : index
    %79 = vector.load %arg13[%c0_39, %c0_40] : memref<16x128xf32, #tpu.memory_space<vmem>>, vector<16x128xf32>
    tpu.vector_store %arg13[%c0_39, %c0_40], %78 {strides = array<i32>} : memref<16x128xf32, #tpu.memory_space<vmem>>, vector<16x128xf32>,
    %c0_41 = arith.constant 0 : index
    %c0_42 = arith.constant 0 : index
    %80 = vector.load %arg14[%c0_41, %c0_42] : memref<16x128xf32, #tpu.memory_space<vmem>>, vector<16x128xf32>
    tpu.vector_store %arg14[%c0_41, %c0_42], %31 {strides = array<i32>} : memref<16x128xf32, #tpu.memory_space<vmem>>, vector<16x128xf32>,
    return
  }
  func.func @transform_0(%arg0: i32) -> (i32, i32) {
    %c0_i32 = arith.constant 0 : i32
    %c0_i32_0 = arith.constant 0 : i32
    return %arg0, %c0_i32 : i32, i32
  }
  func.func @transform_1(%arg0: i32) -> (i32, i32) {
    %c0_i32 = arith.constant 0 : i32
    %c0_i32_0 = arith.constant 0 : i32
    return %arg0, %c0_i32 : i32, i32
  }
  func.func @transform_2(%arg0: i32) -> (i32, i32) {
    %c0_i32 = arith.constant 0 : i32
    %c0_i32_0 = arith.constant 0 : i32
    %c0_i32_1 = arith.constant 0 : i32
    return %c0_i32, %c0_i32_0 : i32, i32
  }
  func.func @transform_3(%arg0: i32) -> (i32, i32) {
    %c0_i32 = arith.constant 0 : i32
    %c0_i32_0 = arith.constant 0 : i32
    %c0_i32_1 = arith.constant 0 : i32
    return %c0_i32, %c0_i32_0 : i32, i32
  }
  func.func @transform_4(%arg0: i32) -> (i32, i32) {
    %c0_i32 = arith.constant 0 : i32
    %c0_i32_0 = arith.constant 0 : i32
    %c0_i32_1 = arith.constant 0 : i32
    return %c0_i32, %c0_i32_0 : i32, i32
  }
  func.func @transform_5(%arg0: i32) -> (i32, i32) {
    %c0_i32 = arith.constant 0 : i32
    %c0_i32_0 = arith.constant 0 : i32
    %c0_i32_1 = arith.constant 0 : i32
    return %c0_i32, %c0_i32_0 : i32, i32
  }
  func.func @transform_6(%arg0: i32) -> (i32, i32) {
    %c0_i32 = arith.constant 0 : i32
    %c0_i32_0 = arith.constant 0 : i32
    %c0_i32_1 = arith.constant 0 : i32
    return %c0_i32, %c0_i32_0 : i32, i32
  }
  func.func @transform_7(%arg0: i32) -> (i32, i32) {
    %c0_i32 = arith.constant 0 : i32
    %c0_i32_0 = arith.constant 0 : i32
    %c0_i32_1 = arith.constant 0 : i32
    return %c0_i32, %c0_i32_0 : i32, i32
  }
  func.func @transform_8(%arg0: i32) -> (i32, i32) {
    %c0_i32 = arith.constant 0 : i32
    %c0_i32_0 = arith.constant 0 : i32
    %c0_i32_1 = arith.constant 0 : i32
    return %c0_i32, %c0_i32_0 : i32, i32
  }
  func.func @transform_9(%arg0: i32) -> (i32, i32) {
    %c0_i32 = arith.constant 0 : i32
    %c0_i32_0 = arith.constant 0 : i32
    %c0_i32_1 = arith.constant 0 : i32
    return %c0_i32, %c0_i32_0 : i32, i32
  }
  func.func @transform_10(%arg0: i32) -> (i32, i32) {
    %c0_i32 = arith.constant 0 : i32
    %c0_i32_0 = arith.constant 0 : i32
    %c0_i32_1 = arith.constant 0 : i32
    return %c0_i32, %c0_i32_0 : i32, i32
  }
  func.func @transform_11(%arg0: i32) -> (i32, i32) {
    %c0_i32 = arith.constant 0 : i32
    %c0_i32_0 = arith.constant 0 : i32
    %c0_i32_1 = arith.constant 0 : i32
    return %c0_i32, %c0_i32_0 : i32, i32
  }
  func.func @transform_12(%arg0: i32) -> (i32, i32) {
    %c0_i32 = arith.constant 0 : i32
    %c0_i32_0 = arith.constant 0 : i32
    return %arg0, %c0_i32 : i32, i32
  }
  func.func @transform_13(%arg0: i32) -> (i32, i32) {
    %c0_i32 = arith.constant 0 : i32
    %c0_i32_0 = arith.constant 0 : i32
    return %arg0, %c0_i32 : i32, i32
  }
}

module attributes {stable_mosaic.version = 11 : i64} {
  func.func @block_kernel(%arg0: i32, %arg1: memref<16x128xf32, #tpu.memory_space<vmem>>, %arg2: memref<16x128xf32, #tpu.memory_space<vmem>>, %arg3: memref<1x128xf32, #tpu.memory_space<vmem>>, %arg4: memref<1x128xf32, #tpu.memory_space<vmem>>, %arg5: memref<128x128xbf16, #tpu.memory_space<vmem>>, %arg6: memref<1x128xf32, #tpu.memory_space<vmem>>, %arg7: memref<1x128xf32, #tpu.memory_space<vmem>>, %arg8: memref<1x128xf32, #tpu.memory_space<vmem>>, %arg9: memref<128x512xbf16, #tpu.memory_space<vmem>>, %arg10: memref<1x512xf32, #tpu.memory_space<vmem>>, %arg11: memref<512x128xbf16, #tpu.memory_space<vmem>>, %arg12: memref<1x128xf32, #tpu.memory_space<vmem>>, %arg13: memref<16x128xf32, #tpu.memory_space<vmem>>, %arg14: memref<16x128xf32, #tpu.memory_space<vmem>>) attributes {dimension_semantics = [#tpu.dimension_semantics<parallel>], iteration_bounds = array<i64: 1>, scalar_prefetch = 0 : i64, scratch_operands = 0 : i64, tpu.core_type = #tpu.core_type<tc>, window_params = [{transform_indices = @transform_0, window_bounds = array<i64: 16, 128>}, {transform_indices = @transform_1, window_bounds = array<i64: 16, 128>}, {pipeline_mode = #tpu.pipeline_mode<synchronous>, transform_indices = @transform_2, window_bounds = array<i64: 1, 128>}, {pipeline_mode = #tpu.pipeline_mode<synchronous>, transform_indices = @transform_3, window_bounds = array<i64: 1, 128>}, {pipeline_mode = #tpu.pipeline_mode<synchronous>, transform_indices = @transform_4, window_bounds = array<i64: 128, 128>}, {pipeline_mode = #tpu.pipeline_mode<synchronous>, transform_indices = @transform_5, window_bounds = array<i64: 1, 128>}, {pipeline_mode = #tpu.pipeline_mode<synchronous>, transform_indices = @transform_6, window_bounds = array<i64: 1, 128>}, {pipeline_mode = #tpu.pipeline_mode<synchronous>, transform_indices = @transform_7, window_bounds = array<i64: 1, 128>}, {pipeline_mode = #tpu.pipeline_mode<synchronous>, transform_indices = @transform_8, window_bounds = array<i64: 128, 512>}, {pipeline_mode = #tpu.pipeline_mode<synchronous>, transform_indices = @transform_9, window_bounds = array<i64: 1, 512>}, {pipeline_mode = #tpu.pipeline_mode<synchronous>, transform_indices = @transform_10, window_bounds = array<i64: 512, 128>}, {pipeline_mode = #tpu.pipeline_mode<synchronous>, transform_indices = @transform_11, window_bounds = array<i64: 1, 128>}, {transform_indices = @transform_12, window_bounds = array<i64: 16, 128>}, {transform_indices = @transform_13, window_bounds = array<i64: 16, 128>}]} {
    %c0 = arith.constant 0 : index
    %c0_0 = arith.constant 0 : index
    %0 = vector.load %arg1[%c0, %c0_0] : memref<16x128xf32, #tpu.memory_space<vmem>>, vector<16x128xf32>
    %c0_1 = arith.constant 0 : index
    %c0_2 = arith.constant 0 : index
    %1 = vector.load %arg2[%c0_1, %c0_2] : memref<16x128xf32, #tpu.memory_space<vmem>>, vector<16x128xf32>
    %2 = arith.addf %0, %1 : vector<16x128xf32>
    %c0_3 = arith.constant 0 : index
    %c0_4 = arith.constant 0 : index
    %3 = vector.load %arg3[%c0_3, %c0_4] : memref<1x128xf32, #tpu.memory_space<vmem>>, vector<1x128xf32>
    %c0_5 = arith.constant 0 : index
    %c0_6 = arith.constant 0 : index
    %4 = vector.load %arg4[%c0_5, %c0_6] : memref<1x128xf32, #tpu.memory_space<vmem>>, vector<1x128xf32>
    %cst = arith.constant dense<0.000000e+00> : vector<16xf32>
    %5 = vector.multi_reduction <add>, %2, %cst [1] : vector<16x128xf32> to vector<16xf32>
    %6 = vector.shape_cast %5 : vector<16xf32> to vector<16x1xf32>
    %cst_7 = arith.constant 1.280000e+02 : f32
    %7 = vector.broadcast %cst_7 : f32 to vector<16x1xf32>
    %8 = arith.divf %6, %7 : vector<16x1xf32>
    %9 = vector.broadcast %8 : vector<16x1xf32> to vector<16x128xf32>
    %10 = arith.subf %2, %9 : vector<16x128xf32>
    %11 = arith.mulf %10, %10 : vector<16x128xf32>
    %cst_8 = arith.constant dense<0.000000e+00> : vector<16xf32>
    %12 = vector.multi_reduction <add>, %11, %cst_8 [1] : vector<16x128xf32> to vector<16xf32>
    %13 = vector.shape_cast %12 : vector<16xf32> to vector<16x1xf32>
    %cst_9 = arith.constant 1.280000e+02 : f32
    %14 = vector.broadcast %cst_9 : f32 to vector<16x1xf32>
    %15 = arith.divf %13, %14 : vector<16x1xf32>
    %cst_10 = arith.constant 9.99999974E-6 : f32
    %16 = vector.broadcast %cst_10 : f32 to vector<16x1xf32>
    %17 = arith.addf %15, %16 : vector<16x1xf32>
    %18 = math.rsqrt %17 : vector<16x1xf32>
    %19 = vector.broadcast %18 : vector<16x1xf32> to vector<16x128xf32>
    %20 = arith.mulf %10, %19 : vector<16x128xf32>
    %21 = vector.broadcast %3 : vector<1x128xf32> to vector<16x128xf32>
    %22 = arith.mulf %20, %21 : vector<16x128xf32>
    %23 = vector.broadcast %4 : vector<1x128xf32> to vector<16x128xf32>
    %24 = arith.addf %22, %23 : vector<16x128xf32>
    %25 = arith.truncf %24 : vector<16x128xf32> to vector<16x128xbf16>
    %c0_11 = arith.constant 0 : index
    %c0_12 = arith.constant 0 : index
    %26 = vector.load %arg5[%c0_11, %c0_12] : memref<128x128xbf16, #tpu.memory_space<vmem>>, vector<128x128xbf16>
    %cst_13 = arith.constant dense<0.000000e+00> : vector<16x128xf32>
    %27 = tpu.matmul %25, %26, %cst_13 {dimension_numbers = #tpu.dot_dimension_numbers<[1], [0], [0], [1], [0, 0, 1, 1], [], []>} : vector<16x128xbf16>, vector<128x128xbf16>, vector<16x128xf32> -> vector<16x128xf32>
    %c0_14 = arith.constant 0 : index
    %c0_15 = arith.constant 0 : index
    %28 = vector.load %arg6[%c0_14, %c0_15] : memref<1x128xf32, #tpu.memory_space<vmem>>, vector<1x128xf32>
    %29 = vector.broadcast %28 : vector<1x128xf32> to vector<16x128xf32>
    %30 = arith.addf %27, %29 : vector<16x128xf32>
    %31 = arith.addf %30, %2 : vector<16x128xf32>
    %c0_16 = arith.constant 0 : index
    %c0_17 = arith.constant 0 : index
    %32 = vector.load %arg7[%c0_16, %c0_17] : memref<1x128xf32, #tpu.memory_space<vmem>>, vector<1x128xf32>
    %c0_18 = arith.constant 0 : index
    %c0_19 = arith.constant 0 : index
    %33 = vector.load %arg8[%c0_18, %c0_19] : memref<1x128xf32, #tpu.memory_space<vmem>>, vector<1x128xf32>
    %cst_20 = arith.constant dense<0.000000e+00> : vector<16xf32>
    %34 = vector.multi_reduction <add>, %31, %cst_20 [1] : vector<16x128xf32> to vector<16xf32>
    %35 = vector.shape_cast %34 : vector<16xf32> to vector<16x1xf32>
    %cst_21 = arith.constant 1.280000e+02 : f32
    %36 = vector.broadcast %cst_21 : f32 to vector<16x1xf32>
    %37 = arith.divf %35, %36 : vector<16x1xf32>
    %38 = vector.broadcast %37 : vector<16x1xf32> to vector<16x128xf32>
    %39 = arith.subf %31, %38 : vector<16x128xf32>
    %40 = arith.mulf %39, %39 : vector<16x128xf32>
    %cst_22 = arith.constant dense<0.000000e+00> : vector<16xf32>
    %41 = vector.multi_reduction <add>, %40, %cst_22 [1] : vector<16x128xf32> to vector<16xf32>
    %42 = vector.shape_cast %41 : vector<16xf32> to vector<16x1xf32>
    %cst_23 = arith.constant 1.280000e+02 : f32
    %43 = vector.broadcast %cst_23 : f32 to vector<16x1xf32>
    %44 = arith.divf %42, %43 : vector<16x1xf32>
    %cst_24 = arith.constant 9.99999974E-6 : f32
    %45 = vector.broadcast %cst_24 : f32 to vector<16x1xf32>
    %46 = arith.addf %44, %45 : vector<16x1xf32>
    %47 = math.rsqrt %46 : vector<16x1xf32>
    %48 = vector.broadcast %47 : vector<16x1xf32> to vector<16x128xf32>
    %49 = arith.mulf %39, %48 : vector<16x128xf32>
    %50 = vector.broadcast %32 : vector<1x128xf32> to vector<16x128xf32>
    %51 = arith.mulf %49, %50 : vector<16x128xf32>
    %52 = vector.broadcast %33 : vector<1x128xf32> to vector<16x128xf32>
    %53 = arith.addf %51, %52 : vector<16x128xf32>
    %54 = arith.truncf %53 : vector<16x128xf32> to vector<16x128xbf16>
    %c0_25 = arith.constant 0 : index
    %c0_26 = arith.constant 0 : index
    %55 = vector.load %arg9[%c0_25, %c0_26] : memref<128x512xbf16, #tpu.memory_space<vmem>>, vector<128x512xbf16>
    %cst_27 = arith.constant dense<0.000000e+00> : vector<16x512xf32>
    %56 = tpu.matmul %54, %55, %cst_27 {dimension_numbers = #tpu.dot_dimension_numbers<[1], [0], [0], [1], [0, 0, 1, 1], [], []>} : vector<16x128xbf16>, vector<128x512xbf16>, vector<16x512xf32> -> vector<16x512xf32>
    %c0_28 = arith.constant 0 : index
    %c0_29 = arith.constant 0 : index
    %57 = vector.load %arg10[%c0_28, %c0_29] : memref<1x512xf32, #tpu.memory_space<vmem>>, vector<1x512xf32>
    %58 = vector.broadcast %57 : vector<1x512xf32> to vector<16x512xf32>
    %59 = arith.addf %56, %58 : vector<16x512xf32>
    %60 = arith.mulf %59, %59 : vector<16x512xf32>
    %61 = arith.mulf %59, %60 : vector<16x512xf32>
    %cst_30 = arith.constant 4.471500e-02 : f32
    %62 = vector.broadcast %cst_30 : f32 to vector<16x512xf32>
    %63 = arith.mulf %62, %61 : vector<16x512xf32>
    %64 = arith.addf %59, %63 : vector<16x512xf32>
    %cst_31 = arith.constant 0.797884583 : f32
    %65 = vector.broadcast %cst_31 : f32 to vector<16x512xf32>
    %66 = arith.mulf %65, %64 : vector<16x512xf32>
    %67 = math.tanh %66 : vector<16x512xf32>
    %cst_32 = arith.constant 1.000000e+00 : f32
    %68 = vector.broadcast %cst_32 : f32 to vector<16x512xf32>
    %69 = arith.addf %68, %67 : vector<16x512xf32>
    %cst_33 = arith.constant 5.000000e-01 : f32
    %70 = vector.broadcast %cst_33 : f32 to vector<16x512xf32>
    %71 = arith.mulf %70, %69 : vector<16x512xf32>
    %72 = arith.mulf %59, %71 : vector<16x512xf32>
    %73 = arith.truncf %72 : vector<16x512xf32> to vector<16x512xbf16>
    %c0_34 = arith.constant 0 : index
    %c0_35 = arith.constant 0 : index
    %74 = vector.load %arg11[%c0_34, %c0_35] : memref<512x128xbf16, #tpu.memory_space<vmem>>, vector<512x128xbf16>
    %cst_36 = arith.constant dense<0.000000e+00> : vector<16x128xf32>
    %75 = tpu.matmul %73, %74, %cst_36 {dimension_numbers = #tpu.dot_dimension_numbers<[1], [0], [0], [1], [0, 0, 1, 1], [], []>} : vector<16x512xbf16>, vector<512x128xbf16>, vector<16x128xf32> -> vector<16x128xf32>
    %c0_37 = arith.constant 0 : index
    %c0_38 = arith.constant 0 : index
    %76 = vector.load %arg12[%c0_37, %c0_38] : memref<1x128xf32, #tpu.memory_space<vmem>>, vector<1x128xf32>
    %77 = vector.broadcast %76 : vector<1x128xf32> to vector<16x128xf32>
    %78 = arith.addf %75, %77 : vector<16x128xf32>
    %c0_39 = arith.constant 0 : index
    %c0_40 = arith.constant 0 : index
    %79 = vector.load %arg13[%c0_39, %c0_40] : memref<16x128xf32, #tpu.memory_space<vmem>>, vector<16x128xf32>
    tpu.vector_store %arg13[%c0_39, %c0_40], %78 {strides = array<i32>} : memref<16x128xf32, #tpu.memory_space<vmem>>, vector<16x128xf32>,
    %c0_41 = arith.constant 0 : index
    %c0_42 = arith.constant 0 : index
    %80 = vector.load %arg14[%c0_41, %c0_42] : memref<16x128xf32, #tpu.memory_space<vmem>>, vector<16x128xf32>
    tpu.vector_store %arg14[%c0_41, %c0_42], %31 {strides = array<i32>} : memref<16x128xf32, #tpu.memory_space<vmem>>, vector<16x128xf32>,
    return
  }
  func.func @transform_0(%arg0: i32) -> (i32, i32) {
    %c0_i32 = arith.constant 0 : i32
    %c0_i32_0 = arith.constant 0 : i32
    return %arg0, %c0_i32 : i32, i32
  }
  func.func @transform_1(%arg0: i32) -> (i32, i32) {
    %c0_i32 = arith.constant 0 : i32
    %c0_i32_0 = arith.constant 0 : i32
    return %arg0, %c0_i32 : i32, i32
  }
  func.func @transform_2(%arg0: i32) -> (i32, i32) {
    %c0_i32 = arith.constant 0 : i32
    %c0_i32_0 = arith.constant 0 : i32
    %c0_i32_1 = arith.constant 0 : i32
    return %c0_i32, %c0_i32_0 : i32, i32
  }
  func.func @transform_3(%arg0: i32) -> (i32, i32) {
    %c0_i32 = arith.constant 0 : i32
    %c0_i32_0 = arith.constant 0 : i32
    %c0_i32_1 = arith.constant 0 : i32
    return %c0_i32, %c0_i32_0 : i32, i32
  }
  func.func @transform_4(%arg0: i32) -> (i32, i32) {
    %c0_i32 = arith.constant 0 : i32
    %c0_i32_0 = arith.constant 0 : i32
    %c0_i32_1 = arith.constant 0 : i32
    return %c0_i32, %c0_i32_0 : i32, i32
  }
  func.func @transform_5(%arg0: i32) -> (i32, i32) {
    %c0_i32 = arith.constant 0 : i32
    %c0_i32_0 = arith.constant 0 : i32
    %c0_i32_1 = arith.constant 0 : i32
    return %c0_i32, %c0_i32_0 : i32, i32
  }
  func.func @transform_6(%arg0: i32) -> (i32, i32) {
    %c0_i32 = arith.constant 0 : i32
    %c0_i32_0 = arith.constant 0 : i32
    %c0_i32_1 = arith.constant 0 : i32
    return %c0_i32, %c0_i32_0 : i32, i32
  }
  func.func @transform_7(%arg0: i32) -> (i32, i32) {
    %c0_i32 = arith.constant 0 : i32
    %c0_i32_0 = arith.constant 0 : i32
    %c0_i32_1 = arith.constant 0 : i32
    return %c0_i32, %c0_i32_0 : i32, i32
  }
  func.func @transform_8(%arg0: i32) -> (i32, i32) {
    %c0_i32 = arith.constant 0 : i32
    %c0_i32_0 = arith.constant 0 : i32
    %c0_i32_1 = arith.constant 0 : i32
    return %c0_i32, %c0_i32_0 : i32, i32
  }
  func.func @transform_9(%arg0: i32) -> (i32, i32) {
    %c0_i32 = arith.constant 0 : i32
    %c0_i32_0 = arith.constant 0 : i32
    %c0_i32_1 = arith.constant 0 : i32
    return %c0_i32, %c0_i32_0 : i32, i32
  }
  func.func @transform_10(%arg0: i32) -> (i32, i32) {
    %c0_i32 = arith.constant 0 : i32
    %c0_i32_0 = arith.constant 0 : i32
    %c0_i32_1 = arith.constant 0 : i32
    return %c0_i32, %c0_i32_0 : i32, i32
  }
  func.func @transform_11(%arg0: i32) -> (i32, i32) {
    %c0_i32 = arith.constant 0 : i32
    %c0_i32_0 = arith.constant 0 : i32
    %c0_i32_1 = arith.constant 0 : i32
    return %c0_i32, %c0_i32_0 : i32, i32
  }
  func.func @transform_12(%arg0: i32) -> (i32, i32) {
    %c0_i32 = arith.constant 0 : i32
    %c0_i32_0 = arith.constant 0 : i32
    return %arg0, %c0_i32 : i32, i32
  }
  func.func @transform_13(%arg0: i32) -> (i32, i32) {
    %c0_i32 = arith.constant 0 : i32
    %c0_i32_0 = arith.constant 0 : i32
    return %arg0, %c0_i32 : i32, i32
  }
}

</mosaic_0001>

<bundles_post_ra>
// kernel: tpu_custom_call.1
= control target key start
LH: loop header
LB: loop body
LE: loop exit
PB: predicated region body
PF: predicated region fallthrough
CT: control target
= control target key end

     0   :  { %19 = vsyncpa [#allocation3], 0  ;;  %s1901_s0 = inlined_call_operand.hbm [shape: f32[16,128], index: 0, kind: input, shape index: {}]   ;;  %s1902_s1 = inlined_call_operand.hbm [shape: f32[16,128], index: 1, kind: input, shape index: {}]   ;;  %s1903_s2 = inlined_call_operand.vmem [shape: f32[1,128], index: 2, kind: input, shape index: {}]   ;;  %s1904_s3 = inlined_call_operand.vmem [shape: f32[1,128], index: 3, kind: input, shape index: {}]   ;;  %s1905_s4 = inlined_call_operand.hbm [shape: bf16[128,128], index: 4, kind: input, shape index: {}]   ;;  %s1906_s5 = inlined_call_operand.vmem [shape: f32[1,128], index: 5, kind: input, shape index: {}]   ;;  %s1907_s6 = inlined_call_operand.hbm [shape: f32[1,128], index: 6, kind: input, shape index: {}]   ;;  %s1908_s7 = inlined_call_operand.hbm [shape: f32[1,128], index: 7, kind: input, shape index: {}]   ;;  %s1909_s8 = inlined_call_operand.hbm [shape: bf16[128,512], index: 8, kind: input, shape index: {}]   ;;  %s1910_s9 = inlined_call_operand.vmem [shape: f32[1,512], index: 9, kind: input, shape index: {}]   ;;  %s1911_s10 = inlined_call_operand.hbm [shape: bf16[512,128], index: 10, kind: input, shape index: {}]   ;;  %s1912_s11 = inlined_call_operand.vmem [shape: f32[1,128], index: 11, kind: input, shape index: {}]   ;;  %s1913_s12 = inlined_call_operand.hbm [shape: f32[16,128], index: 12, kind: output, shape index: {0}]   ;;  %s1914_s13 = inlined_call_operand.hbm [shape: f32[16,128], index: 13, kind: output, shape index: {1}]  }
   0x1   :  { %20 = vsyncpa [#allocation6], 0 }
   0x2   :  { %21 = vsyncpa [#allocation9], 0 }
   0x3   :  { %22 = vsyncpa [#allocation12], 0 }
   0x4   :  { %23 = vsyncpa [#allocation4], 0 }
   0x5   :  { %24 = vsyncpa [#allocation16], 0  ;;  %s42_s27 = sshll.u32 %s1902_s1, 4  ;;  %s1683_s28 = smov [#allocation5]   ;;  %s43_s27 = int_to_ptr.hbm [resolvable:$true] %s42_s27 }
   0x6   :  { %s44_s29 = sshll.u32 %s1683_s28, 4  ;;  %s75_s15 = sshll.u32 %s1907_s6, 4  ;;  %s45_s29 = int_to_ptr.vmem [resolvable:$true] %s44_s29  ;;  %s76_s15 = int_to_ptr.hbm [resolvable:$true] %s75_s15 }
   0x7   :  { %s1684_s16 = smov 128   ;;  %s1685_s17 = smov 8  }
   0x8   :  { %50 = dma.hbm_to_vmem [thread:$0]  %s43_s27, 256, %s45_s29, [#allocation6], %s1684_s16, %s1684_s16, %s1685_s17  }
   0x9   :  { %s1686_s18 = smov [#allocation8]   ;;  %s96_s1 = sshll.u32 %s1909_s8, 4  ;;  %s97_s1 = int_to_ptr.hbm [resolvable:$true] %s96_s1 }
   0xa   :  { %s77_s19 = sshll.u32 %s1686_s18, 4  ;;  %s1687_s22 = smov [#allocation11]   ;;  %s78_s19 = int_to_ptr.vmem [resolvable:$true] %s77_s19 }
   0xb   :  { %80 = dma.hbm_to_vmem [thread:$0]  %s76_s15, 16, %s78_s19, [#allocation9]  }
   0xc   :  { %s98_s23 = sshll.u32 %s1687_s22, 4  ;;  %s29_s25 = sshll.u32 %s1901_s0, 4  ;;  %s99_s23 = int_to_ptr.vmem [resolvable:$true] %s98_s23  ;;  %s30_s25 = int_to_ptr.hbm [resolvable:$true] %s29_s25 }
   0xd   :  { %s1688_s26 = smov 256   ;;  %s1689_s28 = smov 16  }
   0xe   :  { %104 = dma.hbm_to_vmem [thread:$0]  %s97_s1, 4096, %s99_s23, [#allocation12], %s1688_s26, %s1688_s26, %s1689_s28  }
   0xf   :  { %s1690_s27 = smov [#allocation2]   ;;  %s59_s8 = sshll.u32 %s1905_s4, 4  ;;  %s60_s8 = int_to_ptr.hbm [resolvable:$true] %s59_s8 }
  0x10   :  { %s31_s29 = sshll.u32 %s1690_s27, 4  ;;  %s1691_s15 = smov [#allocation7]   ;;  %s32_s29 = int_to_ptr.vmem [resolvable:$true] %s31_s29 }
  0x11   :  { %37 = dma.hbm_to_vmem [thread:$0]  %s30_s25, 256, %s32_s29, [#allocation3], %s1684_s16, %s1684_s16, %s1685_s17  }
  0x12   :  { %s61_s18 = sshll.u32 %s1691_s15, 4  ;;  %s86_s20 = sshll.u32 %s1908_s7, 4  ;;  %s62_s18 = int_to_ptr.vmem [resolvable:$true] %s61_s18  ;;  %s87_s20 = int_to_ptr.hbm [resolvable:$true] %s86_s20 }
  0x13   :  { %s1692_s21 = smov 64   ;;  %s1693_s1 = smov 4  }
  0x14   :  { %67 = dma.hbm_to_vmem [thread:$0]  %s60_s8, 1024, %s62_s18, [#allocation6], %s1692_s21, %s1692_s21, %s1693_s1  }
  0x15   :  { %s1694_s22 = smov [#allocation10]   ;;  %s111_s24 = sshll.u32 %s1911_s10, 4  ;;  %s112_s24 = int_to_ptr.hbm [resolvable:$true] %s111_s24 }
  0x16   :  { %s88_s23 = sshll.u32 %s1694_s22, 4  ;;  %s1695_s25 = smov [#allocation13]   ;;  %s89_s23 = int_to_ptr.vmem [resolvable:$true] %s88_s23 }
  0x17   :  { %91 = dma.hbm_to_vmem [thread:$0]  %s87_s20, 16, %s89_s23, [#allocation9]  }
  0x18   :  { %s113_s26 = sshll.u32 %s1695_s25, 4  ;;  %s114_s26 = int_to_ptr.vmem [resolvable:$true] %s113_s26 }
  0x19   :  { %119 = dma.hbm_to_vmem [thread:$0]  %s112_s24, 4096, %s114_s26, [#allocation12], %s1692_s21, %s1692_s21, %s1693_s1  }
  0x1a   :  { %1671 = dma.done.wait [#allocation3], 256  }
  0x1b   :  { %1672 = vsyncadd [#allocation3], 4294967040 }
  0x1c   :  { %1673 = dma.done.wait [#allocation6], 1280  }
  0x1d   :  { %1674 = vsyncadd [#allocation6], 4294966016 }
  0x1e   :  { %1675 = dma.done.wait [#allocation9], 32  }
  0x1f   :  { %1676 = vsyncadd [#allocation9], 4294967264 }
  0x20   :  { %1677 = dma.done.wait [#allocation12], 8192  }
  0x21   :  { %1678 = vsyncadd [#allocation12], 4294959104  ;;  %v150_v0 = vld [vmem:[#allocation2] sm:$0xff]  ;;  %v152_v1 = vld [vmem:[#allocation5] sm:$0xff]  ;;  %v1696_v6 = vmov 128.0   ;;  %s1026_s15 = sshll.u32 %s1914_s13, 4  ;;  %s1027_s15 = int_to_ptr.hbm [resolvable:$true] %s1026_s15 }
  0x22   :  { %v1796_v2 = vadd.f32 %v152_v1, %v150_v0  ;;  %v151_v3 = vld [vmem:[#allocation2 + $0x8] sm:$0xff]  ;;  %v153_v4 = vld [vmem:[#allocation5 + $0x8] sm:$0xff]  ;;  %1429 = vrcp.f32 %v1696_v6  ;;  %v1341_v22 = vld [vmem:[#allocation7 + $0x30] sm:$0xff]  ;;  %s1698_s13 = smov [#allocation14]   ;;  %s1013_s1 = sshll.u32 %s1913_s12, 4  ;;  %s1014_s1 = int_to_ptr.hbm [resolvable:$true] %s1013_s1 }
  0x23   :  { %v1799_v5 = vadd.f32 %v153_v4, %v151_v3  ;;  %v1342_v21 = vld [vmem:[#allocation7 + $0x38] sm:$0xff]  ;;  %v1340_v23 = vld [vmem:[#allocation7 + $0x28] sm:$0xff]  ;;  %v1339_v24 = vld [vmem:[#allocation7 + $0x20] sm:$0xff]  ;;  %s1011_s19 = sshll.u32 %s1698_s13, 4  ;;  %s1012_s19 = int_to_ptr.vmem [resolvable:$true] %s1011_s19 }
  0x24   :  { %158 = vadd.xlane.f32.xlu0 %v1796_v2  ;;  %284 = vmatpush.bf16.msra.mxu0 %v1342_v21  ;;  %v1338_v25 = vld [vmem:[#allocation7 + $0x18] sm:$0xff]  ;;  %v1337_v26 = vld [vmem:[#allocation7 + $0x10] sm:$0xff]  ;;  %v1336_v27 = vld [vmem:[#allocation7 + $0x8] sm:$0xff] }
  0x25   :  { %v1335_v29 = vld [vmem:[#allocation7] sm:$0xff] }
  0x26   :  { %v1423_v48 = vld [vmem:[%s1903_s2] ss:$0 sm:$0xff] }
  0x27   :  { %v1424_v53 = vld [vmem:[%s1904_s3] ss:$0 sm:$0xff] }
  0x28   :  { %v1430_v7 = vpop.eup %1429  ;;  %285 = vmatpush.bf16.msra.mxu0 %v1341_v22  ;;  %v1425_v58 = vld [vmem:[%s1906_s5] ss:$0 sm:$0xff]  ;;  %v1177_v22 = vld [vmem:[#allocation11 + $0xc0] sm:$0xf]  ;;  %s1697_s5 = smov [#allocation15]  }
  0x29   :  { %v163_v8 = vmul.f32 128.0, %v1430_v7  ;;  %vm167_vm0 = vweird.f32 %v1430_v7 }
  0x2b   :  { %v164_v9 = vsub.f32 1.0, %v163_v8 }
  0x2c   :  { %160 = vadd.xlane.f32.xlu0 %v1799_v5  ;;  %286 = vmatpush.bf16.msra.mxu0 %v1340_v23  ;;  %v1369_v23 = vld [vmem:[#allocation11 + $0xcc] sm:$0xf0] }
  0x2d   :  { %v165_v10 = vmul.f32 %v1430_v7, %v164_v9 }
  0x2f   :  { %v166_v11 = vadd.f32 %v1430_v7, %v165_v10  ;;  %v1373_v10 = vld [vmem:[#allocation11 + $0xec] sm:$0xf0] }
  0x30   :  { %287 = vmatpush.bf16.msra.mxu0 %v1339_v24  ;;  %v1367_v24 = vld [vmem:[#allocation11 + $0xc4] sm:$0xf] }
  0x31   :  { %v1802_v12 = vsel %vm167_vm0, %v1430_v7, %v166_v11  ;;  %v1371_v11 = vld [vmem:[#allocation11 + $0xe4] sm:$0xf] }
  0x34   :  { %288 = vmatpush.bf16.msra.mxu0 %v1338_v25  ;;  %v1178_v25 = vor.u32 %v1369_v23, %v1177_v22  ;;  %v1349_v22 = vld [vmem:[#allocation11 + $0x2c] sm:$0xf0]  ;;  %v1347_v23 = vld [vmem:[#allocation11 + $0x24] sm:$0xf] }
  0x38   :  { %289 = vmatpush.bf16.msra.mxu0 %v1337_v26  ;;  %v1179_v26 = vld [vmem:[#allocation11 + $0xd0] sm:$0xf0] }
  0x3c   :  { %290 = vmatpush.bf16.msra.mxu0 %v1336_v27  ;;  %v1185_v27 = vld [vmem:[#allocation11 + $0xc8] sm:$0xf] }
  0x40   :  { %291 = vmatpush.bf16.msra.mxu0 %v1335_v29  ;;  %v1182_v29 = vor.u32 %v1367_v24, %v1179_v26  ;;  %v1105_v26 = vld [vmem:[#allocation11 + $0x28] sm:$0xf] }
  0x97   :  { %v159_v13 = vpop.xlane.xlu0 %158 }
  0x98   :  { %v169_v14 = vmul.f32 %v1802_v12, %v159_v13 }
  0x9a   :  { %v171_v15 = vsub.f32 %v1796_v2, %v169_v14  ;;  %v1195_v14 = vld [vmem:[#allocation11 + $0xf0] sm:$0xf0] }
  0x9c   :  { %v173_v16 = vmul.f32 %v171_v15, %v171_v15 }
  0x9e   :  { %175 = vadd.xlane.f32.xlu1 %v173_v16  ;;  %v1374_v16 = vld [vmem:[#allocation11 + $0xf4] sm:$0xf0] }
  0x9f   :  { %v161_v17 = vpop.xlane.xlu0 %160 }
  0xa0   :  { %v170_v18 = vmul.f32 %v1802_v12, %v161_v17  ;;  %v1198_v17 = vor.u32 %v1371_v11, %v1195_v14  ;;  %v1121_v14 = vld [vmem:[#allocation11 + $0x48] sm:$0xf] }
  0xa2   :  { %v172_v19 = vsub.f32 %v1799_v5, %v170_v18  ;;  %569 = vmatpush.bf16.msra.mxu2 %v1198_v17 }
  0xa4   :  { %v174_v20 = vmul.f32 %v172_v19, %v172_v19 }
  0xa6   :  { %177 = vadd.xlane.f32.xlu1 %v174_v20  ;;  %v1203_v20 = vld [vmem:[#allocation11 + $0xf8] sm:$0xf0]  ;;  %570 = vmatpush.bf16.msra.mxu2 %v1182_v29 }
 0x111   :  { %v176_v28 = vpop.xlane.xlu1 %175 }
 0x112   :  { %v179_v30 = vmul.f32 %v176_v28, %v1802_v12  ;;  %v1370_v28 = vld [vmem:[#allocation11 + $0xd4] sm:$0xf0] }
 0x114   :  { %v181_v31 = vadd.f32 1e-05, %v179_v30  ;;  %v1186_v30 = vor.u32 %v1370_v28, %v1185_v27  ;;  %v1350_v27 = vld [vmem:[#allocation11 + $0x34] sm:$0xf0] }
 0x115   :  { %v1106_v29 = vor.u32 %v1350_v27, %v1105_v26  ;;  %v1387_v26 = vld [vmem:[#allocation13 + $0x60] sm:$0xff] }
 0x116   :  { %1431 = vrsqrt.f32 %v181_v31  ;;  %vm189_vm2 = vweird.f32 %v181_v31  ;;  %v1395_v27 = vld [vmem:[#allocation13 + $0xa0] sm:$0xff] }
 0x119   :  { %v178_v32 = vpop.xlane.xlu1 %177 }
 0x11a   :  { %v180_v33 = vmul.f32 %v178_v32, %v1802_v12  ;;  %v1187_v32 = vld [vmem:[#allocation11 + $0xd8] sm:$0xf0] }
 0x11c   :  { %v1432_v34 = vpop.eup %1431  ;;  %v182_v35 = vadd.f32 1e-05, %v180_v33 }
 0x11d   :  { %v184_v36 = vmul.f32 %v1432_v34, %v181_v31  ;;  %vm190_vm1 = vweird.f32 %v1432_v34  ;;  %v1368_v31 = vld [vmem:[#allocation11 + $0xcc] sm:$0xf] }
 0x11e   :  { %1433 = vrsqrt.f32 %v182_v35  ;;  %vm191_vm3 = vmor %vm189_vm2, %vm190_vm1  ;;  %vm199_vm5 = vweird.f32 %v182_v35  ;;  %v1190_v33 = vor.u32 %v1368_v31, %v1187_v32  ;;  %v1107_v31 = vld [vmem:[#allocation11 + $0x38] sm:$0xf0]  ;;  %v1081_v32 = vld [vmem:[#allocation11] sm:$0xf] }
 0x11f   :  { %v185_v37 = vmul.f32 %v1432_v34, %v184_v36  ;;  %v1363_v36 = vld [vmem:[#allocation11 + $0xa4] sm:$0xf] }
 0x121   :  { %v186_v38 = vmul.f32 0.5, %v185_v37 }
 0x123   :  { %v187_v39 = vsub.f32 1.5, %v186_v38  ;;  %v1163_v38 = vld [vmem:[#allocation11 + $0xb0] sm:$0xf0] }
 0x124   :  { %v1434_v40 = vpop.eup %1433 }
 0x125   :  { %v188_v41 = vmul.f32 %v1432_v34, %v187_v39  ;;  %v194_v42 = vmul.f32 %v1434_v40, %v182_v35  ;;  %vm200_vm4 = vweird.f32 %v1434_v40  ;;  %v1365_v35 = vld [vmem:[#allocation11 + $0xac] sm:$0xf0]  ;;  %v1169_v39 = vld [vmem:[#allocation11 + $0xa8] sm:$0xf] }
 0x126   :  { %vm201_vm6 = vmor %vm199_vm5, %vm200_vm4 }
 0x127   :  { %v195_v43 = vmul.f32 %v1434_v40, %v194_v42  ;;  %v192_v45 = vsel %vm191_vm3, %v1432_v34, %v188_v41  ;;  %v1161_v34 = vld [vmem:[#allocation11 + $0xa0] sm:$0xf]  ;;  %v1166_v41 = vor.u32 %v1363_v36, %v1163_v38  ;;  %v1343_v36 = vld [vmem:[#allocation11 + $0x4] sm:$0xf] }
 0x128   :  { %v203_v47 = vmul.f32 %v192_v45, %v171_v15  ;;  %v1201_v15 = vld [vmem:[#allocation11 + $0xe8] sm:$0xf]  ;;  %v1162_v37 = vor.u32 %v1365_v35, %v1161_v34  ;;  %v1345_v35 = vld [vmem:[#allocation11 + $0xc] sm:$0xf0] }
 0x129   :  { %v196_v44 = vmul.f32 0.5, %v195_v43  ;;  %v1202_v18 = vor.u32 %v1374_v16, %v1201_v15  ;;  %v1364_v43 = vld [vmem:[#allocation11 + $0xac] sm:$0xf]  ;;  %571 = vmatpush.bf16.msra.mxu2 %v1166_v41  ;;  %v1354_v15 = vld [vmem:[#allocation11 + $0x54] sm:$0xf0] }
 0x12a   :  { %v208_v52 = vmul.f32 %v1423_v48, %v203_v47  ;;  %v1361_v47 = vld [vmem:[#allocation11 + $0x8c] sm:$0xf0]  ;;  %v1122_v17 = vor.u32 %v1354_v15, %v1121_v14  ;;  %v1089_v41 = vld [vmem:[#allocation11 + $0x8] sm:$0xf]  ;;  %v1390_v15 = vld [vmem:[#allocation13 + $0x78] sm:$0xff] }
 0x12b   :  { %v197_v46 = vsub.f32 1.5, %v196_v44  ;;  %583 = vmatpush.bf16.msra.mxu3 %v1202_v18  ;;  %v1171_v44 = vld [vmem:[#allocation11 + $0xb8] sm:$0xf0]  ;;  %v1352_v18 = vld [vmem:[#allocation11 + $0x4c] sm:$0xf]  ;;  %v1405_v14 = vld [vmem:[#allocation13 + $0xf0] sm:$0xff] }
 0x12c   :  { %v213_v55 = vadd.f32 %v1424_v53, %v208_v52  ;;  %v1174_v45 = vor.u32 %v1364_v43, %v1171_v44  ;;  %v1362_v52 = vld [vmem:[#allocation11 + $0x94] sm:$0xf0]  ;;  %v1344_v43 = vld [vmem:[#allocation11 + $0xc] sm:$0xf] }
 0x12d   :  { %v198_v49 = vmul.f32 %v1434_v40, %v197_v46  ;;  %v1145_v46 = vld [vmem:[#allocation11 + $0x80] sm:$0xf] }
 0x12f   :  { %v202_v50 = vsel %vm201_vm6, %v1434_v40, %v198_v49  ;;  %584 = vmatpush.bf16.msra.mxu3 %v1186_v30  ;;  %v1366_v40 = vld [vmem:[#allocation11 + $0xb4] sm:$0xf0]  ;;  %v1146_v49 = vor.u32 %v1361_v47, %v1145_v46  ;;  %v1348_v30 = vld [vmem:[#allocation11 + $0x2c] sm:$0xf] }
 0x130   :  { %v204_v51 = vmul.f32 %v202_v50, %v172_v19  ;;  %v1372_v19 = vld [vmem:[#allocation11 + $0xec] sm:$0xf]  ;;  %v1170_v42 = vor.u32 %v1366_v40, %v1169_v39  ;;  %v1147_v50 = vld [vmem:[#allocation11 + $0x90] sm:$0xf0]  ;;  %v1110_v34 = vor.u32 %v1348_v30, %v1107_v31  ;;  %v1082_v39 = vor.u32 %v1345_v35, %v1081_v32  ;;  %v1838_v30 = vld [vmem:[%s1910_s9] sm:$0xf] }
 0x131   :  { %v1206_v21 = vor.u32 %v1372_v19, %v1203_v20  ;;  %v1123_v19 = vld [vmem:[#allocation11 + $0x58] sm:$0xf0]  ;;  %v387_v35 = vperm.slane %v1838_v30, 0  ;;  %s1024_s9 = sshll.u32 %s1697_s5, 4  ;;  %s1025_s9 = int_to_ptr.vmem [resolvable:$true] %s1024_s9 }
 0x132   :  { %v209_v54 = vmul.f32 %v1423_v48, %v204_v51  ;;  %v1359_v48 = vld [vmem:[#allocation11 + $0x84] sm:$0xf]  ;;  %v1153_v51 = vld [vmem:[#allocation11 + $0x88] sm:$0xf]  ;;  %v1126_v20 = vor.u32 %v1352_v18, %v1123_v19  ;;  %v1389_v18 = vld [vmem:[#allocation13 + $0x70] sm:$0xff] }
 0x133   :  { %597 = vmatpush.bf16.msrb.mxu0 %v1206_v21  ;;  %585 = vmatpush.bf16.msra.mxu3 %v1170_v42  ;;  %v1097_v21 = vld [vmem:[#allocation11 + $0x20] sm:$0xf]  ;;  %v1346_v42 = vld [vmem:[#allocation11 + $0x14] sm:$0xf0]  ;;  %v1397_v19 = vld [vmem:[#allocation13 + $0xb0] sm:$0xff] }
 0x134   :  { %v214_v56 = vadd.f32 %v1424_v53, %v209_v54  ;;  %v1150_v53 = vor.u32 %v1359_v48, %v1147_v50  ;;  %v1154_v54 = vor.u32 %v1362_v52, %v1153_v51  ;;  %v1098_v24 = vor.u32 %v1349_v22, %v1097_v21  ;;  %v1403_v21 = vld [vmem:[#allocation13 + $0xe0] sm:$0xff]  ;;  %v1388_v22 = vld [vmem:[#allocation13 + $0x68] sm:$0xff]  ;;  %v1386_v31 = vld [vmem:[#allocation13 + $0x58] sm:$0xff] }
 0x135   :  { %v1090_v44 = vor.u32 %v1346_v42, %v1089_v41  ;;  %v1394_v32 = vld [vmem:[#allocation13 + $0x98] sm:$0xff]  ;;  %v1399_v41 = vld [vmem:[#allocation13 + $0xc0] sm:$0xff] }
 0x136   :  { %v215_v57 = vpack.c.bf16 %v214_v56, %v213_v55  ;;  %v1360_v55 = vld [vmem:[#allocation11 + $0x8c] sm:$0xf]  ;;  %v1155_v56 = vld [vmem:[#allocation11 + $0x98] sm:$0xf0]  ;;  %572 = vmatpush.bf16.msra.mxu2 %v1150_v53 }
 0x137   :  { %598 = vmatpush.bf16.msrb.mxu0 %v1190_v33  ;;  %586 = vmatpush.bf16.msra.mxu3 %v1154_v54 }
 0x138   :  { %292 = vmatmul.bf16.vlgmr.msra.gmra.mxu0 %v215_v57  ;;  %v1158_v57 = vor.u32 %v1360_v55, %v1155_v56 }
 0x13b   :  { %599 = vmatpush.bf16.msrb.mxu0 %v1174_v45  ;;  %v1091_v45 = vld [vmem:[#allocation11 + $0x18] sm:$0xf0] }
 0x13c   :  { %v1094_v47 = vor.u32 %v1344_v43, %v1091_v45  ;;  %v1392_v45 = vld [vmem:[#allocation13 + $0x88] sm:$0xff] }
 0x13f   :  { %600 = vmatpush.bf16.msrb.mxu0 %v1158_v57 }
 0x1b5   :  { %v293_v59 = vpop.f32.mrf.mxu0 }
 0x1b6   :  { %v294_v60 = vadd.f32 %v1425_v58, %v293_v59  ;;  %v1357_v59 = vld [vmem:[#allocation11 + $0x6c] sm:$0xf0] }
 0x1b8   :  { %v298_v61 = vadd.f32 %v294_v60, %v1796_v2  ;;  %v1355_v60 = vld [vmem:[#allocation11 + $0x64] sm:$0xf] }
 0x1ba   :  { %1005 = vst [vmem:[#allocation15] sm:$0xff] %v298_v61  ;;  %302 = vadd.xlane.f32.xlu2 %v298_v61 }
 0x1bd   :  { %v295_v62 = vpop.f32.mrf.mxu0 }
 0x1be   :  { %v296_v63 = vadd.f32 %v1425_v58, %v295_v62  ;;  %v1129_v58 = vld [vmem:[#allocation11 + $0x60] sm:$0xf]  ;;  %v1131_v62 = vld [vmem:[#allocation11 + $0x70] sm:$0xf0] }
 0x1c0   :  { %v299_v0 = vadd.f32 %v296_v63, %v1799_v5  ;;  %v1193_v5 = vld [vmem:[#allocation11 + $0xe0] sm:$0xf]  ;;  %v1137_v63 = vld [vmem:[#allocation11 + $0x68] sm:$0xf] }
 0x1c1   :  { %v1194_v13 = vor.u32 %v1373_v10, %v1193_v5  ;;  %v1353_v5 = vld [vmem:[#allocation11 + $0x4c] sm:$0xf0]  ;;  %v1351_v10 = vld [vmem:[#allocation11 + $0x44] sm:$0xf] }
 0x1c2   :  { %1006 = vst [vmem:[#allocation15 + $0x8] sm:$0xff] %v299_v0  ;;  %304 = vadd.xlane.f32.xlu2 %v299_v0 }
 0x1c3   :  { %555 = vmatpush.bf16.msra.mxu1 %v1194_v13  ;;  %v1115_v13 = vld [vmem:[#allocation11 + $0x50] sm:$0xf0]  ;;  %1032 = dma.vmem_to_hbm [thread:$0]  %s1025_s9, 256, %s1027_s15, [#allocation16], %s1684_s16, %s1684_s16, %s1685_s17  }
 0x1c4   :  { %v1118_v16 = vor.u32 %v1351_v10, %v1115_v13  ;;  %v1406_v13 = vld [vmem:[#allocation13 + $0xf8] sm:$0xff] }
 0x1c7   :  { %556 = vmatpush.bf16.msra.mxu1 %v1178_v25  ;;  %v1099_v25 = vld [vmem:[#allocation11 + $0x30] sm:$0xf0] }
 0x1c8   :  { %v1102_v28 = vor.u32 %v1347_v23, %v1099_v25  ;;  %v1396_v23 = vld [vmem:[#allocation13 + $0xa8] sm:$0xff]  ;;  %v1402_v25 = vld [vmem:[#allocation13 + $0xd8] sm:$0xff] }
 0x1cb   :  { %557 = vmatpush.bf16.msra.mxu1 %v1162_v37  ;;  %v1083_v37 = vld [vmem:[#allocation11 + $0x10] sm:$0xf0] }
 0x1cc   :  { %v1086_v40 = vor.u32 %v1343_v36, %v1083_v37  ;;  %v390_v36 = vperm.slane %v1838_v30, 3  ;;  %v1385_v37 = vld [vmem:[#allocation13 + $0x50] sm:$0xff] }
 0x1cf   :  { %558 = vmatpush.bf16.msra.mxu1 %v1146_v49 }
 0x22d   :  { %v303_v1 = vpop.xlane.xlu2 %302 }
 0x22e   :  { %v306_v3 = vmul.f32 %v303_v1, %v1802_v12  ;;  %v1134_v1 = vor.u32 %v1355_v60, %v1131_v62 }
 0x230   :  { %v1822_v4 = vsub.f32 %v298_v61, %v306_v3  ;;  %v1130_v61 = vor.u32 %v1357_v59, %v1129_v58  ;;  %573 = vmatpush.bf16.msra.mxu2 %v1134_v1 }
 0x232   :  { %v310_v6 = vmul.f32 %v1822_v4, %v1822_v4  ;;  %559 = vmatpush.bf16.msra.mxu1 %v1130_v61 }
 0x234   :  { %312 = vadd.xlane.f32.xlu0 %v310_v6  ;;  %v1356_v6 = vld [vmem:[#allocation11 + $0x6c] sm:$0xf]  ;;  %574 = vmatpush.bf16.msra.mxu2 %v1118_v16 }
 0x235   :  { %v305_v7 = vpop.xlane.xlu2 %304  ;;  %v1380_v16 = vld [vmem:[#allocation13 + $0x28] sm:$0xff] }
 0x236   :  { %v307_v2 = vmul.f32 %v305_v7, %v1802_v12  ;;  %v1139_v7 = vld [vmem:[#allocation11 + $0x78] sm:$0xf0] }
 0x238   :  { %v1827_v8 = vsub.f32 %v299_v0, %v307_v2  ;;  %v1358_v0 = vld [vmem:[#allocation11 + $0x74] sm:$0xf0]  ;;  %v1142_v2 = vor.u32 %v1356_v6, %v1139_v7  ;;  %575 = vmatpush.bf16.msra.mxu2 %v1102_v28  ;;  %v1427_v7 = vld [vmem:[#allocation10] ss:$0 sm:$0xff]  ;;  %v1377_v28 = vld [vmem:[#allocation13 + $0x10] sm:$0xff] }
 0x239   :  { %v1138_v3 = vor.u32 %v1358_v0, %v1137_v63  ;;  %v1426_v63 = vld [vmem:[#allocation8] ss:$0 sm:$0xff] }
 0x23a   :  { %v311_v9 = vmul.f32 %v1827_v8, %v1827_v8  ;;  %601 = vmatpush.bf16.msrb.mxu0 %v1142_v2 }
 0x23b   :  { %587 = vmatpush.bf16.msra.mxu3 %v1138_v3 }
 0x23c   :  { %314 = vadd.xlane.f32.xlu1 %v311_v9  ;;  %v1113_v9 = vld [vmem:[#allocation11 + $0x40] sm:$0xf]  ;;  %576 = vmatpush.bf16.msra.mxu2 %v1086_v40 }
 0x23d   :  { %v1114_v11 = vor.u32 %v1353_v5, %v1113_v9  ;;  %v1375_v40 = vld [vmem:[#allocation13] sm:$0xff] }
 0x23e   :  { %602 = vmatpush.bf16.msrb.mxu0 %v1126_v20  ;;  %v1379_v20 = vld [vmem:[#allocation13 + $0x20] sm:$0xff] }
 0x23f   :  { %560 = vmatpush.bf16.msra.mxu1 %v1114_v11  ;;  %588 = vmatpush.bf16.msra.mxu3 %v1122_v17  ;;  %v1382_v11 = vld [vmem:[#allocation13 + $0x38] sm:$0xff]  ;;  %v1404_v17 = vld [vmem:[#allocation13 + $0xe8] sm:$0xff] }
 0x240   :  { %961 = vmatpush.bf16.msrb.mxu2 %v1390_v15 }
 0x242   :  { %603 = vmatpush.bf16.msrb.mxu0 %v1110_v34  ;;  %v1400_v34 = vld [vmem:[#allocation13 + $0xc8] sm:$0xff] }
 0x243   :  { %561 = vmatpush.bf16.msra.mxu1 %v1098_v24  ;;  %589 = vmatpush.bf16.msra.mxu3 %v1106_v29  ;;  %v1378_v24 = vld [vmem:[#allocation13 + $0x18] sm:$0xff]  ;;  %v1401_v29 = vld [vmem:[#allocation13 + $0xd0] sm:$0xff] }
 0x244   :  { %962 = vmatpush.bf16.msrb.mxu2 %v1389_v18 }
 0x246   :  { %604 = vmatpush.bf16.msrb.mxu0 %v1094_v47 }
 0x247   :  { %562 = vmatpush.bf16.msra.mxu1 %v1082_v39  ;;  %590 = vmatpush.bf16.msra.mxu3 %v1090_v44  ;;  %v1384_v44 = vld [vmem:[#allocation13 + $0x48] sm:$0xff] }
 0x248   :  { %963 = vmatpush.bf16.msrb.mxu2 %v1388_v22 }
 0x24a   :  { %989 = vmatpush.bf16.msra.mxu0 %v1406_v13 }
 0x24b   :  { %947 = vmatpush.bf16.msrb.mxu1 %v1382_v11 }
 0x24c   :  { %964 = vmatpush.bf16.msrb.mxu2 %v1387_v26 }
 0x24e   :  { %990 = vmatpush.bf16.msra.mxu0 %v1405_v14 }
 0x250   :  { %965 = vmatpush.bf16.msrb.mxu2 %v1386_v31 }
 0x252   :  { %991 = vmatpush.bf16.msra.mxu0 %v1404_v17 }
 0x254   :  { %966 = vmatpush.bf16.msrb.mxu2 %v1385_v37 }
 0x256   :  { %992 = vmatpush.bf16.msra.mxu0 %v1403_v21 }
 0x258   :  { %967 = vmatpush.bf16.msrb.mxu2 %v1384_v44 }
 0x25a   :  { %993 = vmatpush.bf16.msra.mxu0 %v1402_v25 }
 0x25e   :  { %994 = vmatpush.bf16.msra.mxu0 %v1401_v29 }
 0x262   :  { %995 = vmatpush.bf16.msra.mxu0 %v1400_v34 }
 0x266   :  { %996 = vmatpush.bf16.msra.mxu0 %v1399_v41 }
 0x2a7   :  { %v313_v33 = vpop.xlane.xlu0 %312 }
 0x2a8   :  { %v316_v38 = vmul.f32 %v313_v33, %v1802_v12  ;;  %v1376_v33 = vld [vmem:[#allocation13 + $0x8] sm:$0xff] }
 0x2aa   :  { %v318_v46 = vadd.f32 1e-05, %v316_v38  ;;  %v1393_v38 = vld [vmem:[#allocation13 + $0x90] sm:$0xff] }
 0x2ac   :  { %1435 = vrsqrt.f32 %v318_v46  ;;  %vm326_vm8 = vweird.f32 %v318_v46 }
 0x2af   :  { %v315_v48 = vpop.xlane.xlu1 %314 }
 0x2b0   :  { %v317_v49 = vmul.f32 %v315_v48, %v1802_v12  ;;  %v388_v48 = vperm.slane %v1838_v30, 1 }
 0x2b2   :  { %v1436_v50 = vpop.eup %1435  ;;  %v319_v51 = vadd.f32 1e-05, %v317_v49 }
 0x2b3   :  { %v321_v52 = vmul.f32 %v1436_v50, %v318_v46  ;;  %vm327_vm7 = vweird.f32 %v1436_v50 }
 0x2b4   :  { %1437 = vrsqrt.f32 %v319_v51  ;;  %vm328_vm9 = vmor %vm326_vm8, %vm327_vm7  ;;  %vm336_vm11 = vweird.f32 %v319_v51 }
 0x2b5   :  { %v322_v53 = vmul.f32 %v1436_v50, %v321_v52  ;;  %v1383_v52 = vld [vmem:[#allocation13 + $0x40] sm:$0xff] }
 0x2b6   :  { %968 = vmatpush.bf16.msrb.mxu2 %v1383_v52 }
 0x2b7   :  { %v323_v54 = vmul.f32 0.5, %v322_v53  ;;  %v1391_v53 = vld [vmem:[#allocation13 + $0x80] sm:$0xff] }
 0x2b9   :  { %v324_v55 = vsub.f32 1.5, %v323_v54 }
 0x2ba   :  { %v1438_v56 = vpop.eup %1437 }
 0x2bb   :  { %v325_v57 = vmul.f32 %v1436_v50, %v324_v55  ;;  %v331_v58 = vmul.f32 %v1438_v56, %v319_v51  ;;  %vm337_vm10 = vweird.f32 %v1438_v56 }
 0x2bc   :  { %vm338_vm12 = vmor %vm336_vm11, %vm337_vm10 }
 0x2bd   :  { %v332_v59 = vmul.f32 %v1438_v56, %v331_v58  ;;  %v329_v60 = vsel %vm328_vm9, %v1436_v50, %v325_v57  ;;  %v389_v50 = vperm.slane %v1838_v30, 2 }
 0x2be   :  { %v340_v12 = vmul.f32 %v329_v60, %v1822_v4  ;;  %v1381_v4 = vld [vmem:[#allocation13 + $0x30] sm:$0xff] }
 0x2bf   :  { %v333_v61 = vmul.f32 0.5, %v332_v59  ;;  %948 = vmatpush.bf16.msrb.mxu1 %v1381_v4 }
 0x2c0   :  { %v345_v6 = vmul.f32 %v1426_v63, %v340_v12 }
 0x2c1   :  { %v334_v62 = vsub.f32 1.5, %v333_v61 }
 0x2c2   :  { %v350_v9 = vadd.f32 %v1427_v7, %v345_v6 }
 0x2c3   :  { %v335_v0 = vmul.f32 %v1438_v56, %v334_v62  ;;  %949 = vmatpush.bf16.msrb.mxu1 %v1380_v16 }
 0x2c5   :  { %v339_v1 = vsel %vm338_vm12, %v1438_v56, %v335_v0 }
 0x2c6   :  { %v341_v3 = vmul.f32 %v339_v1, %v1827_v8  ;;  %v1398_v8 = vld [vmem:[#allocation13 + $0xb8] sm:$0xff] }
 0x2c7   :  { %975 = vmatpush.bf16.msrb.mxu3 %v1398_v8  ;;  %950 = vmatpush.bf16.msrb.mxu1 %v1379_v20 }
 0x2c8   :  { %v346_v2 = vmul.f32 %v1426_v63, %v341_v3 }
 0x2ca   :  { %v351_v5 = vadd.f32 %v1427_v7, %v346_v2 }
 0x2cb   :  { %976 = vmatpush.bf16.msrb.mxu3 %v1397_v19  ;;  %951 = vmatpush.bf16.msrb.mxu1 %v1378_v24 }
 0x2cc   :  { %v352_v10 = vpack.c.bf16 %v351_v5, %v350_v9 }
 0x2ce   :  { %563 = vmatmul.bf16.vlgmr.msra.gmra.mxu1 %v352_v10  ;;  %577 = vmatmul.bf16.vlgmr.msra.gmra.mxu2 %v352_v10 }
 0x2cf   :  { %591 = vmatmul.bf16.vlgmr.msra.gmra.mxu3 %v352_v10  ;;  %605 = vmatmul.bf16.vlgmr.msrb.gmra.mxu0 %v352_v10 }
 0x2d0   :  { %977 = vmatpush.bf16.msrb.mxu3 %v1396_v23  ;;  %952 = vmatpush.bf16.msrb.mxu1 %v1377_v28 }
 0x2d4   :  { %978 = vmatpush.bf16.msrb.mxu3 %v1395_v27  ;;  %953 = vmatpush.bf16.msrb.mxu1 %v1376_v33 }
 0x2d8   :  { %979 = vmatpush.bf16.msrb.mxu3 %v1394_v32  ;;  %954 = vmatpush.bf16.msrb.mxu1 %v1375_v40 }
 0x2dc   :  { %980 = vmatpush.bf16.msrb.mxu3 %v1393_v38 }
 0x2e0   :  { %981 = vmatpush.bf16.msrb.mxu3 %v1392_v45 }
 0x2e4   :  { %982 = vmatpush.bf16.msrb.mxu3 %v1391_v53 }
 0x34b   :  { %v564_v39 = vpop.f32.mrf.mxu1 }
 0x34c   :  { %v1842_v42 = vadd.f32 %v564_v39, %v387_v35  ;;  %v606_v43 = vpop.f32.mrf.mxu0 }
 0x34d   :  { %v1844_v46 = vadd.f32 %v606_v43, %v390_v36 }
 0x34e   :  { %v611_v47 = vmul.f32 %v1842_v42, %v1842_v42 }
 0x34f   :  { %v614_v49 = vmul.f32 %v1844_v46, %v1844_v46 }
 0x350   :  { %v619_v51 = vmul.f32 %v611_v47, %v1842_v42 }
 0x351   :  { %v622_v54 = vmul.f32 %v614_v49, %v1844_v46  ;;  %v578_v55 = vpop.f32.mrf.mxu2 }
 0x352   :  { %v627_v56 = vmul.f32 0.044715, %v619_v51  ;;  %v1854_v57 = vadd.f32 %v578_v55, %v388_v48  ;;  %v592_v58 = vpop.f32.mrf.mxu3 }
 0x353   :  { %v630_v59 = vmul.f32 0.044715, %v622_v54  ;;  %v1856_v60 = vadd.f32 %v592_v58, %v389_v50  ;;  %v566_v61 = vpop.f32.mrf.mxu1 }
 0x354   :  { %v635_v62 = vadd.f32 %v627_v56, %v1842_v42  ;;  %v612_v12 = vmul.f32 %v1854_v57, %v1854_v57  ;;  %v1861_v63 = vadd.f32 %v566_v61, %v387_v35  ;;  %v608_v0 = vpop.f32.mrf.mxu0 }
 0x355   :  { %v638_v1 = vadd.f32 %v630_v59, %v1844_v46  ;;  %v613_v3 = vmul.f32 %v1856_v60, %v1856_v60  ;;  %v1866_v6 = vadd.f32 %v608_v0, %v390_v36 }
 0x356   :  { %v643_v7 = vmul.f32 0.7978846, %v635_v62  ;;  %v620_v2 = vmul.f32 %v612_v12, %v1854_v57  ;;  %v615_v9 = vmul.f32 %v1861_v63, %v1861_v63 }
 0x357   :  { %v646_v5 = vmul.f32 0.7978846, %v638_v1  ;;  %v621_v10 = vmul.f32 %v613_v3, %v1856_v60  ;;  %v618_v11 = vmul.f32 %v1866_v6, %v1866_v6 }
 0x358   :  { %v628_v13 = vmul.f32 0.044715, %v620_v2  ;;  %v623_v4 = vmul.f32 %v615_v9, %v1861_v63  ;;  %1439 = vtanh.f32 %v643_v7 }
 0x359   :  { %v629_v14 = vmul.f32 0.044715, %v621_v10  ;;  %v626_v15 = vmul.f32 %v618_v11, %v1866_v6  ;;  %v580_v8 = vpop.f32.mrf.mxu2  ;;  %1441 = vtanh.f32 %v646_v5 }
 0x35a   :  { %v636_v16 = vadd.f32 %v628_v13, %v1854_v57  ;;  %v631_v17 = vmul.f32 0.044715, %v623_v4  ;;  %v581_v18 = vadd.f32 %v580_v8, %v388_v48  ;;  %v594_v19 = vpop.f32.mrf.mxu3 }
 0x35b   :  { %v637_v20 = vadd.f32 %v629_v14, %v1856_v60  ;;  %v634_v21 = vmul.f32 0.044715, %v626_v15  ;;  %v595_v22 = vadd.f32 %v594_v19, %v389_v50 }
 0x35c   :  { %v644_v23 = vmul.f32 0.7978846, %v636_v16  ;;  %v639_v24 = vadd.f32 %v631_v17, %v1861_v63  ;;  %v616_v25 = vmul.f32 %v581_v18, %v581_v18 }
 0x35d   :  { %v645_v26 = vmul.f32 0.7978846, %v637_v20  ;;  %v642_v27 = vadd.f32 %v634_v21, %v1866_v6  ;;  %v617_v28 = vmul.f32 %v595_v22, %v595_v22 }
 0x35e   :  { %1443 = vtanh.f32 %v644_v23  ;;  %v647_v29 = vmul.f32 0.7978846, %v639_v24  ;;  %v624_v30 = vmul.f32 %v616_v25, %v581_v18  ;;  %v1440_v33 = vpop.eup %1439 }
 0x35f   :  { %1445 = vtanh.f32 %v645_v26  ;;  %v650_v31 = vmul.f32 0.7978846, %v642_v27  ;;  %v625_v32 = vmul.f32 %v617_v28, %v595_v22  ;;  %v1442_v35 = vpop.eup %1441  ;;  %v659_v39 = vadd.f32 1.0, %v1440_v33 }
 0x360   :  { %1447 = vtanh.f32 %v647_v29  ;;  %v632_v34 = vmul.f32 0.044715, %v624_v30  ;;  %v662_v41 = vadd.f32 1.0, %v1442_v35 }
 0x361   :  { %1449 = vtanh.f32 %v650_v31  ;;  %v633_v36 = vmul.f32 0.044715, %v625_v32  ;;  %v667_v50 = vmul.f32 0.5, %v659_v39 }
 0x362   :  { %v640_v37 = vadd.f32 %v632_v34, %v581_v18  ;;  %v670_v51 = vmul.f32 0.5, %v662_v41 }
 0x363   :  { %v641_v38 = vadd.f32 %v633_v36, %v595_v22  ;;  %v675_v58 = vmul.f32 %v667_v50, %v1842_v42 }
 0x364   :  { %v1444_v40 = vpop.eup %1443  ;;  %v648_v43 = vmul.f32 0.7978846, %v640_v37  ;;  %v678_v62 = vmul.f32 %v670_v51, %v1844_v46 }
 0x365   :  { %v1446_v44 = vpop.eup %1445  ;;  %v649_v45 = vmul.f32 0.7978846, %v641_v38  ;;  %v660_v54 = vadd.f32 1.0, %v1444_v40 }
 0x366   :  { %v1448_v47 = vpop.eup %1447  ;;  %1451 = vtanh.f32 %v648_v43  ;;  %v661_v56 = vadd.f32 1.0, %v1446_v44 }
 0x367   :  { %v1450_v48 = vpop.eup %1449  ;;  %1453 = vtanh.f32 %v649_v45  ;;  %v663_v49 = vadd.f32 1.0, %v1448_v47  ;;  %v668_v7 = vmul.f32 0.5, %v660_v54 }
 0x368   :  { %v666_v52 = vadd.f32 1.0, %v1450_v48  ;;  %v669_v5 = vmul.f32 0.5, %v661_v56 }
 0x369   :  { %v671_v53 = vmul.f32 0.5, %v663_v49  ;;  %v676_v42 = vmul.f32 %v668_v7, %v1854_v57 }
 0x36a   :  { %v674_v55 = vmul.f32 0.5, %v666_v52 }
 0x36b   :  { %v679_v59 = vmul.f32 %v671_v53, %v1861_v63  ;;  %v677_v63 = vmul.f32 %v669_v5, %v1856_v60  ;;  %v1428_v60 = vld [vmem:[%s1912_s11] ss:$0 sm:$0xff] }
 0x36c   :  { %v1452_v61 = vpop.eup %1451  ;;  %v682_v12 = vmul.f32 %v674_v55, %v1866_v6 }
 0x36d   :  { %v1454_v0 = vpop.eup %1453  ;;  %v683_v1 = vpack.c.bf16 %v679_v59, %v675_v58  ;;  %v664_v3 = vadd.f32 1.0, %v1452_v61 }
 0x36e   :  { %v686_v2 = vpack.c.bf16 %v682_v12, %v678_v62  ;;  %v665_v9 = vadd.f32 1.0, %v1454_v0 }
 0x36f   :  { %955 = vmatmul.bf16.vlgmr.msrb.gmra.mxu1 %v683_v1  ;;  %v672_v10 = vmul.f32 0.5, %v664_v3 }
 0x370   :  { %997 = vmatmul.bf16.vlgmr.msra.gmra.mxu0 %v686_v2  ;;  %v673_v11 = vmul.f32 0.5, %v665_v9 }
 0x371   :  { %v680_v13 = vmul.f32 %v672_v10, %v581_v18 }
 0x372   :  { %v681_v4 = vmul.f32 %v673_v11, %v595_v22 }
 0x373   :  { %v684_v46 = vpack.c.bf16 %v680_v13, %v676_v42 }
 0x374   :  { %v685_v14 = vpack.c.bf16 %v681_v4, %v677_v63 }
 0x375   :  { %969 = vmatmul.bf16.vlgmr.msrb.gmra.mxu2 %v684_v46 }
 0x376   :  { %983 = vmatmul.bf16.vlgmr.msrb.gmra.mxu3 %v685_v14 }
 0x3ec   :  { %v956_v57 = vpop.f32.mrf.mxu1 }
 0x3ed   :  { %v957_v6 = vadd.f32 %v1428_v60, %v956_v57  ;;  %v998_v17 = vpop.f32.mrf.mxu0 }
 0x3f4   :  { %v958_v19 = vpop.f32.mrf.mxu1 }
 0x3f5   :  { %v959_v21 = vadd.f32 %v1428_v60, %v958_v19  ;;  %v1000_v26 = vpop.f32.mrf.mxu0 }
 0x3f8   :  { %v970_v15 = vpop.f32.mrf.mxu2 }
 0x3f9   :  { %v971_v8 = vadd.f32 %v970_v15, %v957_v6  ;;  %v984_v16 = vpop.f32.mrf.mxu3 }
 0x3fb   :  { %v985_v18 = vadd.f32 %v984_v16, %v971_v8 }
 0x3fd   :  { %v999_v20 = vadd.f32 %v998_v17, %v985_v18 }
 0x3ff   :  { %1003 = vst [vmem:[#allocation14] sm:$0xff] %v999_v20 }
 0x400   :  { %v972_v22 = vpop.f32.mrf.mxu2 }
 0x401   :  { %v973_v23 = vadd.f32 %v972_v22, %v959_v21  ;;  %v986_v24 = vpop.f32.mrf.mxu3 }
 0x403   :  { %v987_v25 = vadd.f32 %v986_v24, %v973_v23 }
 0x405   :  { %v1001_v27 = vadd.f32 %v1000_v26, %v987_v25 }
 0x407   :  { %1004 = vst [vmem:[#allocation14 + $0x8] sm:$0xff] %v1001_v27 }
 0x408   :  { %1019 = dma.vmem_to_hbm [thread:$0]  %s1012_s19, 256, %s1014_s1, [#allocation4], %s1684_s16, %s1684_s16, %s1685_s17  }
 0x409   :  { %1679 = dma.done.wait [#allocation4], 256  }
 0x40a   :  { %1680 = vsyncadd [#allocation4], 4294967040 }
 0x40b   :  { %1681 = dma.done.wait [#allocation16], 256  }
 0x40c   :  { %1682 = vsyncadd [#allocation16], 4294967040 }
 0x40d   :  { %1041 = vsyncpa [#allocation3], 1 }
 0x40e   :  { %1042 = vsyncpa [#allocation6], 1 }
 0x40f   :  { %1043 = vsyncpa [#allocation9], 1 }
 0x410   :  { %1044 = vsyncpa [#allocation12], 1 }
 0x411   :  { %1045 = vsyncpa [#allocation4], 1 }
 0x412   :  { %1046 = vsyncpa [#allocation16], 1 }

// kernel: tpu_custom_call.1
= control target key start
LH: loop header
LB: loop body
LE: loop exit
PB: predicated region body
PF: predicated region fallthrough
CT: control target
= control target key end

     0   :  { %19 = vsyncpa [#allocation3], 0  ;;  %s1901_s0 = inlined_call_operand.hbm [shape: f32[16,128], index: 0, kind: input, shape index: {}]   ;;  %s1902_s1 = inlined_call_operand.hbm [shape: f32[16,128], index: 1, kind: input, shape index: {}]   ;;  %s1903_s2 = inlined_call_operand.vmem [shape: f32[1,128], index: 2, kind: input, shape index: {}]   ;;  %s1904_s3 = inlined_call_operand.vmem [shape: f32[1,128], index: 3, kind: input, shape index: {}]   ;;  %s1905_s4 = inlined_call_operand.hbm [shape: bf16[128,128], index: 4, kind: input, shape index: {}]   ;;  %s1906_s5 = inlined_call_operand.vmem [shape: f32[1,128], index: 5, kind: input, shape index: {}]   ;;  %s1907_s6 = inlined_call_operand.hbm [shape: f32[1,128], index: 6, kind: input, shape index: {}]   ;;  %s1908_s7 = inlined_call_operand.hbm [shape: f32[1,128], index: 7, kind: input, shape index: {}]   ;;  %s1909_s8 = inlined_call_operand.hbm [shape: bf16[128,512], index: 8, kind: input, shape index: {}]   ;;  %s1910_s9 = inlined_call_operand.vmem [shape: f32[1,512], index: 9, kind: input, shape index: {}]   ;;  %s1911_s10 = inlined_call_operand.hbm [shape: bf16[512,128], index: 10, kind: input, shape index: {}]   ;;  %s1912_s11 = inlined_call_operand.vmem [shape: f32[1,128], index: 11, kind: input, shape index: {}]   ;;  %s1913_s12 = inlined_call_operand.hbm [shape: f32[16,128], index: 12, kind: output, shape index: {0}]   ;;  %s1914_s13 = inlined_call_operand.hbm [shape: f32[16,128], index: 13, kind: output, shape index: {1}]  }
   0x1   :  { %20 = vsyncpa [#allocation6], 0 }
   0x2   :  { %21 = vsyncpa [#allocation9], 0 }
   0x3   :  { %22 = vsyncpa [#allocation12], 0 }
   0x4   :  { %23 = vsyncpa [#allocation4], 0 }
   0x5   :  { %24 = vsyncpa [#allocation16], 0  ;;  %s42_s27 = sshll.u32 %s1902_s1, 4  ;;  %s1683_s28 = smov [#allocation5]   ;;  %s43_s27 = int_to_ptr.hbm [resolvable:$true] %s42_s27 }
   0x6   :  { %s44_s29 = sshll.u32 %s1683_s28, 4  ;;  %s75_s15 = sshll.u32 %s1907_s6, 4  ;;  %s45_s29 = int_to_ptr.vmem [resolvable:$true] %s44_s29  ;;  %s76_s15 = int_to_ptr.hbm [resolvable:$true] %s75_s15 }
   0x7   :  { %s1684_s16 = smov 128   ;;  %s1685_s17 = smov 8  }
   0x8   :  { %50 = dma.hbm_to_vmem [thread:$0]  %s43_s27, 256, %s45_s29, [#allocation6], %s1684_s16, %s1684_s16, %s1685_s17  }
   0x9   :  { %s1686_s18 = smov [#allocation8]   ;;  %s96_s1 = sshll.u32 %s1909_s8, 4  ;;  %s97_s1 = int_to_ptr.hbm [resolvable:$true] %s96_s1 }
   0xa   :  { %s77_s19 = sshll.u32 %s1686_s18, 4  ;;  %s1687_s22 = smov [#allocation11]   ;;  %s78_s19 = int_to_ptr.vmem [resolvable:$true] %s77_s19 }
   0xb   :  { %80 = dma.hbm_to_vmem [thread:$0]  %s76_s15, 16, %s78_s19, [#allocation9]  }
   0xc   :  { %s98_s23 = sshll.u32 %s1687_s22, 4  ;;  %s29_s25 = sshll.u32 %s1901_s0, 4  ;;  %s99_s23 = int_to_ptr.vmem [resolvable:$true] %s98_s23  ;;  %s30_s25 = int_to_ptr.hbm [resolvable:$true] %s29_s25 }
   0xd   :  { %s1688_s26 = smov 256   ;;  %s1689_s28 = smov 16  }
   0xe   :  { %104 = dma.hbm_to_vmem [thread:$0]  %s97_s1, 4096, %s99_s23, [#allocation12], %s1688_s26, %s1688_s26, %s1689_s28  }
   0xf   :  { %s1690_s27 = smov [#allocation2]   ;;  %s59_s8 = sshll.u32 %s1905_s4, 4  ;;  %s60_s8 = int_to_ptr.hbm [resolvable:$true] %s59_s8 }
  0x10   :  { %s31_s29 = sshll.u32 %s1690_s27, 4  ;;  %s1691_s15 = smov [#allocation7]   ;;  %s32_s29 = int_to_ptr.vmem [resolvable:$true] %s31_s29 }
  0x11   :  { %37 = dma.hbm_to_vmem [thread:$0]  %s30_s25, 256, %s32_s29, [#allocation3], %s1684_s16, %s1684_s16, %s1685_s17  }
  0x12   :  { %s61_s18 = sshll.u32 %s1691_s15, 4  ;;  %s86_s20 = sshll.u32 %s1908_s7, 4  ;;  %s62_s18 = int_to_ptr.vmem [resolvable:$true] %s61_s18  ;;  %s87_s20 = int_to_ptr.hbm [resolvable:$true] %s86_s20 }
  0x13   :  { %s1692_s21 = smov 64   ;;  %s1693_s1 = smov 4  }
  0x14   :  { %67 = dma.hbm_to_vmem [thread:$0]  %s60_s8, 1024, %s62_s18, [#allocation6], %s1692_s21, %s1692_s21, %s1693_s1  }
  0x15   :  { %s1694_s22 = smov [#allocation10]   ;;  %s111_s24 = sshll.u32 %s1911_s10, 4  ;;  %s112_s24 = int_to_ptr.hbm [resolvable:$true] %s111_s24 }
  0x16   :  { %s88_s23 = sshll.u32 %s1694_s22, 4  ;;  %s1695_s25 = smov [#allocation13]   ;;  %s89_s23 = int_to_ptr.vmem [resolvable:$true] %s88_s23 }
  0x17   :  { %91 = dma.hbm_to_vmem [thread:$0]  %s87_s20, 16, %s89_s23, [#allocation9]  }
  0x18   :  { %s113_s26 = sshll.u32 %s1695_s25, 4  ;;  %s114_s26 = int_to_ptr.vmem [resolvable:$true] %s113_s26 }
  0x19   :  { %119 = dma.hbm_to_vmem [thread:$0]  %s112_s24, 4096, %s114_s26, [#allocation12], %s1692_s21, %s1692_s21, %s1693_s1  }
  0x1a   :  { %1671 = dma.done.wait [#allocation3], 256  }
  0x1b   :  { %1672 = vsyncadd [#allocation3], 4294967040 }
  0x1c   :  { %1673 = dma.done.wait [#allocation6], 1280  }
  0x1d   :  { %1674 = vsyncadd [#allocation6], 4294966016 }
  0x1e   :  { %1675 = dma.done.wait [#allocation9], 32  }
  0x1f   :  { %1676 = vsyncadd [#allocation9], 4294967264 }
  0x20   :  { %1677 = dma.done.wait [#allocation12], 8192  }
  0x21   :  { %1678 = vsyncadd [#allocation12], 4294959104  ;;  %v150_v0 = vld [vmem:[#allocation2] sm:$0xff]  ;;  %v152_v1 = vld [vmem:[#allocation5] sm:$0xff]  ;;  %v1696_v6 = vmov 128.0   ;;  %s1026_s15 = sshll.u32 %s1914_s13, 4  ;;  %s1027_s15 = int_to_ptr.hbm [resolvable:$true] %s1026_s15 }
  0x22   :  { %v1796_v2 = vadd.f32 %v152_v1, %v150_v0  ;;  %v151_v3 = vld [vmem:[#allocation2 + $0x8] sm:$0xff]  ;;  %v153_v4 = vld [vmem:[#allocation5 + $0x8] sm:$0xff]  ;;  %1429 = vrcp.f32 %v1696_v6  ;;  %v1341_v22 = vld [vmem:[#allocation7 + $0x30] sm:$0xff]  ;;  %s1698_s13 = smov [#allocation14]   ;;  %s1013_s1 = sshll.u32 %s1913_s12, 4  ;;  %s1014_s1 = int_to_ptr.hbm [resolvable:$true] %s1013_s1 }
  0x23   :  { %v1799_v5 = vadd.f32 %v153_v4, %v151_v3  ;;  %v1342_v21 = vld [vmem:[#allocation7 + $0x38] sm:$0xff]  ;;  %v1340_v23 = vld [vmem:[#allocation7 + $0x28] sm:$0xff]  ;;  %v1339_v24 = vld [vmem:[#allocation7 + $0x20] sm:$0xff]  ;;  %s1011_s19 = sshll.u32 %s1698_s13, 4  ;;  %s1012_s19 = int_to_ptr.vmem [resolvable:$true] %s1011_s19 }
  0x24   :  { %158 = vadd.xlane.f32.xlu0 %v1796_v2  ;;  %284 = vmatpush.bf16.msra.mxu0 %v1342_v21  ;;  %v1338_v25 = vld [vmem:[#allocation7 + $0x18] sm:$0xff]  ;;  %v1337_v26 = vld [vmem:[#allocation7 + $0x10] sm:$0xff]  ;;  %v1336_v27 = vld [vmem:[#allocation7 + $0x8] sm:$0xff] }
  0x25   :  { %v1335_v29 = vld [vmem:[#allocation7] sm:$0xff] }
  0x26   :  { %v1423_v48 = vld [vmem:[%s1903_s2] ss:$0 sm:$0xff] }
  0x27   :  { %v1424_v53 = vld [vmem:[%s1904_s3] ss:$0 sm:$0xff] }
  0x28   :  { %v1430_v7 = vpop.eup %1429  ;;  %285 = vmatpush.bf16.msra.mxu0 %v1341_v22  ;;  %v1425_v58 = vld [vmem:[%s1906_s5] ss:$0 sm:$0xff]  ;;  %v1177_v22 = vld [vmem:[#allocation11 + $0xc0] sm:$0xf]  ;;  %s1697_s5 = smov [#allocation15]  }
  0x29   :  { %v163_v8 = vmul.f32 128.0, %v1430_v7  ;;  %vm167_vm0 = vweird.f32 %v1430_v7 }
  0x2b   :  { %v164_v9 = vsub.f32 1.0, %v163_v8 }
  0x2c   :  { %160 = vadd.xlane.f32.xlu0 %v1799_v5  ;;  %286 = vmatpush.bf16.msra.mxu0 %v1340_v23  ;;  %v1369_v23 = vld [vmem:[#allocation11 + $0xcc] sm:$0xf0] }
  0x2d   :  { %v165_v10 = vmul.f32 %v1430_v7, %v164_v9 }
  0x2f   :  { %v166_v11 = vadd.f32 %v1430_v7, %v165_v10  ;;  %v1373_v10 = vld [vmem:[#allocation11 + $0xec] sm:$0xf0] }
  0x30   :  { %287 = vmatpush.bf16.msra.mxu0 %v1339_v24  ;;  %v1367_v24 = vld [vmem:[#allocation11 + $0xc4] sm:$0xf] }
  0x31   :  { %v1802_v12 = vsel %vm167_vm0, %v1430_v7, %v166_v11  ;;  %v1371_v11 = vld [vmem:[#allocation11 + $0xe4] sm:$0xf] }
  0x34   :  { %288 = vmatpush.bf16.msra.mxu0 %v1338_v25  ;;  %v1178_v25 = vor.u32 %v1369_v23, %v1177_v22  ;;  %v1349_v22 = vld [vmem:[#allocation11 + $0x2c] sm:$0xf0]  ;;  %v1347_v23 = vld [vmem:[#allocation11 + $0x24] sm:$0xf] }
  0x38   :  { %289 = vmatpush.bf16.msra.mxu0 %v1337_v26  ;;  %v1179_v26 = vld [vmem:[#allocation11 + $0xd0] sm:$0xf0] }
  0x3c   :  { %290 = vmatpush.bf16.msra.mxu0 %v1336_v27  ;;  %v1185_v27 = vld [vmem:[#allocation11 + $0xc8] sm:$0xf] }
  0x40   :  { %291 = vmatpush.bf16.msra.mxu0 %v1335_v29  ;;  %v1182_v29 = vor.u32 %v1367_v24, %v1179_v26  ;;  %v1105_v26 = vld [vmem:[#allocation11 + $0x28] sm:$0xf] }
  0x97   :  { %v159_v13 = vpop.xlane.xlu0 %158 }
  0x98   :  { %v169_v14 = vmul.f32 %v1802_v12, %v159_v13 }
  0x9a   :  { %v171_v15 = vsub.f32 %v1796_v2, %v169_v14  ;;  %v1195_v14 = vld [vmem:[#allocation11 + $0xf0] sm:$0xf0] }
  0x9c   :  { %v173_v16 = vmul.f32 %v171_v15, %v171_v15 }
  0x9e   :  { %175 = vadd.xlane.f32.xlu1 %v173_v16  ;;  %v1374_v16 = vld [vmem:[#allocation11 + $0xf4] sm:$0xf0] }
  0x9f   :  { %v161_v17 = vpop.xlane.xlu0 %160 }
  0xa0   :  { %v170_v18 = vmul.f32 %v1802_v12, %v161_v17  ;;  %v1198_v17 = vor.u32 %v1371_v11, %v1195_v14  ;;  %v1121_v14 = vld [vmem:[#allocation11 + $0x48] sm:$0xf] }
  0xa2   :  { %v172_v19 = vsub.f32 %v1799_v5, %v170_v18  ;;  %569 = vmatpush.bf16.msra.mxu2 %v1198_v17 }
  0xa4   :  { %v174_v20 = vmul.f32 %v172_v19, %v172_v19 }
  0xa6   :  { %177 = vadd.xlane.f32.xlu1 %v174_v20  ;;  %v1203_v20 = vld [vmem:[#allocation11 + $0xf8] sm:$0xf0]  ;;  %570 = vmatpush.bf16.msra.mxu2 %v1182_v29 }
 0x111   :  { %v176_v28 = vpop.xlane.xlu1 %175 }
 0x112   :  { %v179_v30 = vmul.f32 %v176_v28, %v1802_v12  ;;  %v1370_v28 = vld [vmem:[#allocation11 + $0xd4] sm:$0xf0] }
 0x114   :  { %v181_v31 = vadd.f32 1e-05, %v179_v30  ;;  %v1186_v30 = vor.u32 %v1370_v28, %v1185_v27  ;;  %v1350_v27 = vld [vmem:[#allocation11 + $0x34] sm:$0xf0] }
 0x115   :  { %v1106_v29 = vor.u32 %v1350_v27, %v1105_v26  ;;  %v1387_v26 = vld [vmem:[#allocation13 + $0x60] sm:$0xff] }
 0x116   :  { %1431 = vrsqrt.f32 %v181_v31  ;;  %vm189_vm2 = vweird.f32 %v181_v31  ;;  %v1395_v27 = vld [vmem:[#allocation13 + $0xa0] sm:$0xff] }
 0x119   :  { %v178_v32 = vpop.xlane.xlu1 %177 }
 0x11a   :  { %v180_v33 = vmul.f32 %v178_v32, %v1802_v12  ;;  %v1187_v32 = vld [vmem:[#allocation11 + $0xd8] sm:$0xf0] }
 0x11c   :  { %v1432_v34 = vpop.eup %1431  ;;  %v182_v35 = vadd.f32 1e-05, %v180_v33 }
 0x11d   :  { %v184_v36 = vmul.f32 %v1432_v34, %v181_v31  ;;  %vm190_vm1 = vweird.f32 %v1432_v34  ;;  %v1368_v31 = vld [vmem:[#allocation11 + $0xcc] sm:$0xf] }
 0x11e   :  { %1433 = vrsqrt.f32 %v182_v35  ;;  %vm191_vm3 = vmor %vm189_vm2, %vm190_vm1  ;;  %vm199_vm5 = vweird.f32 %v182_v35  ;;  %v1190_v33 = vor.u32 %v1368_v31, %v1187_v32  ;;  %v1107_v31 = vld [vmem:[#allocation11 + $0x38] sm:$0xf0]  ;;  %v1081_v32 = vld [vmem:[#allocation11] sm:$0xf] }
 0x11f   :  { %v185_v37 = vmul.f32 %v1432_v34, %v184_v36  ;;  %v1363_v36 = vld [vmem:[#allocation11 + $0xa4] sm:$0xf] }
 0x121   :  { %v186_v38 = vmul.f32 0.5, %v185_v37 }
 0x123   :  { %v187_v39 = vsub.f32 1.5, %v186_v38  ;;  %v1163_v38 = vld [vmem:[#allocation11 + $0xb0] sm:$0xf0] }
 0x124   :  { %v1434_v40 = vpop.eup %1433 }
 0x125   :  { %v188_v41 = vmul.f32 %v1432_v34, %v187_v39  ;;  %v194_v42 = vmul.f32 %v1434_v40, %v182_v35  ;;  %vm200_vm4 = vweird.f32 %v1434_v40  ;;  %v1365_v35 = vld [vmem:[#allocation11 + $0xac] sm:$0xf0]  ;;  %v1169_v39 = vld [vmem:[#allocation11 + $0xa8] sm:$0xf] }
 0x126   :  { %vm201_vm6 = vmor %vm199_vm5, %vm200_vm4 }
 0x127   :  { %v195_v43 = vmul.f32 %v1434_v40, %v194_v42  ;;  %v192_v45 = vsel %vm191_vm3, %v1432_v34, %v188_v41  ;;  %v1161_v34 = vld [vmem:[#allocation11 + $0xa0] sm:$0xf]  ;;  %v1166_v41 = vor.u32 %v1363_v36, %v1163_v38  ;;  %v1343_v36 = vld [vmem:[#allocation11 + $0x4] sm:$0xf] }
 0x128   :  { %v203_v47 = vmul.f32 %v192_v45, %v171_v15  ;;  %v1201_v15 = vld [vmem:[#allocation11 + $0xe8] sm:$0xf]  ;;  %v1162_v37 = vor.u32 %v1365_v35, %v1161_v34  ;;  %v1345_v35 = vld [vmem:[#allocation11 + $0xc] sm:$0xf0] }
 0x129   :  { %v196_v44 = vmul.f32 0.5, %v195_v43  ;;  %v1202_v18 = vor.u32 %v1374_v16, %v1201_v15  ;;  %v1364_v43 = vld [vmem:[#allocation11 + $0xac] sm:$0xf]  ;;  %571 = vmatpush.bf16.msra.mxu2 %v1166_v41  ;;  %v1354_v15 = vld [vmem:[#allocation11 + $0x54] sm:$0xf0] }
 0x12a   :  { %v208_v52 = vmul.f32 %v1423_v48, %v203_v47  ;;  %v1361_v47 = vld [vmem:[#allocation11 + $0x8c] sm:$0xf0]  ;;  %v1122_v17 = vor.u32 %v1354_v15, %v1121_v14  ;;  %v1089_v41 = vld [vmem:[#allocation11 + $0x8] sm:$0xf]  ;;  %v1390_v15 = vld [vmem:[#allocation13 + $0x78] sm:$0xff] }
 0x12b   :  { %v197_v46 = vsub.f32 1.5, %v196_v44  ;;  %583 = vmatpush.bf16.msra.mxu3 %v1202_v18  ;;  %v1171_v44 = vld [vmem:[#allocation11 + $0xb8] sm:$0xf0]  ;;  %v1352_v18 = vld [vmem:[#allocation11 + $0x4c] sm:$0xf]  ;;  %v1405_v14 = vld [vmem:[#allocation13 + $0xf0] sm:$0xff] }
 0x12c   :  { %v213_v55 = vadd.f32 %v1424_v53, %v208_v52  ;;  %v1174_v45 = vor.u32 %v1364_v43, %v1171_v44  ;;  %v1362_v52 = vld [vmem:[#allocation11 + $0x94] sm:$0xf0]  ;;  %v1344_v43 = vld [vmem:[#allocation11 + $0xc] sm:$0xf] }
 0x12d   :  { %v198_v49 = vmul.f32 %v1434_v40, %v197_v46  ;;  %v1145_v46 = vld [vmem:[#allocation11 + $0x80] sm:$0xf] }
 0x12f   :  { %v202_v50 = vsel %vm201_vm6, %v1434_v40, %v198_v49  ;;  %584 = vmatpush.bf16.msra.mxu3 %v1186_v30  ;;  %v1366_v40 = vld [vmem:[#allocation11 + $0xb4] sm:$0xf0]  ;;  %v1146_v49 = vor.u32 %v1361_v47, %v1145_v46  ;;  %v1348_v30 = vld [vmem:[#allocation11 + $0x2c] sm:$0xf] }
 0x130   :  { %v204_v51 = vmul.f32 %v202_v50, %v172_v19  ;;  %v1372_v19 = vld [vmem:[#allocation11 + $0xec] sm:$0xf]  ;;  %v1170_v42 = vor.u32 %v1366_v40, %v1169_v39  ;;  %v1147_v50 = vld [vmem:[#allocation11 + $0x90] sm:$0xf0]  ;;  %v1110_v34 = vor.u32 %v1348_v30, %v1107_v31  ;;  %v1082_v39 = vor.u32 %v1345_v35, %v1081_v32  ;;  %v1838_v30 = vld [vmem:[%s1910_s9] sm:$0xf] }
 0x131   :  { %v1206_v21 = vor.u32 %v1372_v19, %v1203_v20  ;;  %v1123_v19 = vld [vmem:[#allocation11 + $0x58] sm:$0xf0]  ;;  %v387_v35 = vperm.slane %v1838_v30, 0  ;;  %s1024_s9 = sshll.u32 %s1697_s5, 4  ;;  %s1025_s9 = int_to_ptr.vmem [resolvable:$true] %s1024_s9 }
 0x132   :  { %v209_v54 = vmul.f32 %v1423_v48, %v204_v51  ;;  %v1359_v48 = vld [vmem:[#allocation11 + $0x84] sm:$0xf]  ;;  %v1153_v51 = vld [vmem:[#allocation11 + $0x88] sm:$0xf]  ;;  %v1126_v20 = vor.u32 %v1352_v18, %v1123_v19  ;;  %v1389_v18 = vld [vmem:[#allocation13 + $0x70] sm:$0xff] }
 0x133   :  { %597 = vmatpush.bf16.msrb.mxu0 %v1206_v21  ;;  %585 = vmatpush.bf16.msra.mxu3 %v1170_v42  ;;  %v1097_v21 = vld [vmem:[#allocation11 + $0x20] sm:$0xf]  ;;  %v1346_v42 = vld [vmem:[#allocation11 + $0x14] sm:$0xf0]  ;;  %v1397_v19 = vld [vmem:[#allocation13 + $0xb0] sm:$0xff] }
 0x134   :  { %v214_v56 = vadd.f32 %v1424_v53, %v209_v54  ;;  %v1150_v53 = vor.u32 %v1359_v48, %v1147_v50  ;;  %v1154_v54 = vor.u32 %v1362_v52, %v1153_v51  ;;  %v1098_v24 = vor.u32 %v1349_v22, %v1097_v21  ;;  %v1403_v21 = vld [vmem:[#allocation13 + $0xe0] sm:$0xff]  ;;  %v1388_v22 = vld [vmem:[#allocation13 + $0x68] sm:$0xff]  ;;  %v1386_v31 = vld [vmem:[#allocation13 + $0x58] sm:$0xff] }
 0x135   :  { %v1090_v44 = vor.u32 %v1346_v42, %v1089_v41  ;;  %v1394_v32 = vld [vmem:[#allocation13 + $0x98] sm:$0xff]  ;;  %v1399_v41 = vld [vmem:[#allocation13 + $0xc0] sm:$0xff] }
 0x136   :  { %v215_v57 = vpack.c.bf16 %v214_v56, %v213_v55  ;;  %v1360_v55 = vld [vmem:[#allocation11 + $0x8c] sm:$0xf]  ;;  %v1155_v56 = vld [vmem:[#allocation11 + $0x98] sm:$0xf0]  ;;  %572 = vmatpush.bf16.msra.mxu2 %v1150_v53 }
 0x137   :  { %598 = vmatpush.bf16.msrb.mxu0 %v1190_v33  ;;  %586 = vmatpush.bf16.msra.mxu3 %v1154_v54 }
 0x138   :  { %292 = vmatmul.bf16.vlgmr.msra.gmra.mxu0 %v215_v57  ;;  %v1158_v57 = vor.u32 %v1360_v55, %v1155_v56 }
 0x13b   :  { %599 = vmatpush.bf16.msrb.mxu0 %v1174_v45  ;;  %v1091_v45 = vld [vmem:[#allocation11 + $0x18] sm:$0xf0] }
 0x13c   :  { %v1094_v47 = vor.u32 %v1344_v43, %v1091_v45  ;;  %v1392_v45 = vld [vmem:[#allocation13 + $0x88] sm:$0xff] }
 0x13f   :  { %600 = vmatpush.bf16.msrb.mxu0 %v1158_v57 }
 0x1b5   :  { %v293_v59 = vpop.f32.mrf.mxu0 }
 0x1b6   :  { %v294_v60 = vadd.f32 %v1425_v58, %v293_v59  ;;  %v1357_v59 = vld [vmem:[#allocation11 + $0x6c] sm:$0xf0] }
 0x1b8   :  { %v298_v61 = vadd.f32 %v294_v60, %v1796_v2  ;;  %v1355_v60 = vld [vmem:[#allocation11 + $0x64] sm:$0xf] }
 0x1ba   :  { %1005 = vst [vmem:[#allocation15] sm:$0xff] %v298_v61  ;;  %302 = vadd.xlane.f32.xlu2 %v298_v61 }
 0x1bd   :  { %v295_v62 = vpop.f32.mrf.mxu0 }
 0x1be   :  { %v296_v63 = vadd.f32 %v1425_v58, %v295_v62  ;;  %v1129_v58 = vld [vmem:[#allocation11 + $0x60] sm:$0xf]  ;;  %v1131_v62 = vld [vmem:[#allocation11 + $0x70] sm:$0xf0] }
 0x1c0   :  { %v299_v0 = vadd.f32 %v296_v63, %v1799_v5  ;;  %v1193_v5 = vld [vmem:[#allocation11 + $0xe0] sm:$0xf]  ;;  %v1137_v63 = vld [vmem:[#allocation11 + $0x68] sm:$0xf] }
 0x1c1   :  { %v1194_v13 = vor.u32 %v1373_v10, %v1193_v5  ;;  %v1353_v5 = vld [vmem:[#allocation11 + $0x4c] sm:$0xf0]  ;;  %v1351_v10 = vld [vmem:[#allocation11 + $0x44] sm:$0xf] }
 0x1c2   :  { %1006 = vst [vmem:[#allocation15 + $0x8] sm:$0xff] %v299_v0  ;;  %304 = vadd.xlane.f32.xlu2 %v299_v0 }
 0x1c3   :  { %555 = vmatpush.bf16.msra.mxu1 %v1194_v13  ;;  %v1115_v13 = vld [vmem:[#allocation11 + $0x50] sm:$0xf0]  ;;  %1032 = dma.vmem_to_hbm [thread:$0]  %s1025_s9, 256, %s1027_s15, [#allocation16], %s1684_s16, %s1684_s16, %s1685_s17  }
 0x1c4   :  { %v1118_v16 = vor.u32 %v1351_v10, %v1115_v13  ;;  %v1406_v13 = vld [vmem:[#allocation13 + $0xf8] sm:$0xff] }
 0x1c7   :  { %556 = vmatpush.bf16.msra.mxu1 %v1178_v25  ;;  %v1099_v25 = vld [vmem:[#allocation11 + $0x30] sm:$0xf0] }
 0x1c8   :  { %v1102_v28 = vor.u32 %v1347_v23, %v1099_v25  ;;  %v1396_v23 = vld [vmem:[#allocation13 + $0xa8] sm:$0xff]  ;;  %v1402_v25 = vld [vmem:[#allocation13 + $0xd8] sm:$0xff] }
 0x1cb   :  { %557 = vmatpush.bf16.msra.mxu1 %v1162_v37  ;;  %v1083_v37 = vld [vmem:[#allocation11 + $0x10] sm:$0xf0] }
 0x1cc   :  { %v1086_v40 = vor.u32 %v1343_v36, %v1083_v37  ;;  %v390_v36 = vperm.slane %v1838_v30, 3  ;;  %v1385_v37 = vld [vmem:[#allocation13 + $0x50] sm:$0xff] }
 0x1cf   :  { %558 = vmatpush.bf16.msra.mxu1 %v1146_v49 }
 0x22d   :  { %v303_v1 = vpop.xlane.xlu2 %302 }
 0x22e   :  { %v306_v3 = vmul.f32 %v303_v1, %v1802_v12  ;;  %v1134_v1 = vor.u32 %v1355_v60, %v1131_v62 }
 0x230   :  { %v1822_v4 = vsub.f32 %v298_v61, %v306_v3  ;;  %v1130_v61 = vor.u32 %v1357_v59, %v1129_v58  ;;  %573 = vmatpush.bf16.msra.mxu2 %v1134_v1 }
 0x232   :  { %v310_v6 = vmul.f32 %v1822_v4, %v1822_v4  ;;  %559 = vmatpush.bf16.msra.mxu1 %v1130_v61 }
 0x234   :  { %312 = vadd.xlane.f32.xlu0 %v310_v6  ;;  %v1356_v6 = vld [vmem:[#allocation11 + $0x6c] sm:$0xf]  ;;  %574 = vmatpush.bf16.msra.mxu2 %v1118_v16 }
 0x235   :  { %v305_v7 = vpop.xlane.xlu2 %304  ;;  %v1380_v16 = vld [vmem:[#allocation13 + $0x28] sm:$0xff] }
 0x236   :  { %v307_v2 = vmul.f32 %v305_v7, %v1802_v12  ;;  %v1139_v7 = vld [vmem:[#allocation11 + $0x78] sm:$0xf0] }
 0x238   :  { %v1827_v8 = vsub.f32 %v299_v0, %v307_v2  ;;  %v1358_v0 = vld [vmem:[#allocation11 + $0x74] sm:$0xf0]  ;;  %v1142_v2 = vor.u32 %v1356_v6, %v1139_v7  ;;  %575 = vmatpush.bf16.msra.mxu2 %v1102_v28  ;;  %v1427_v7 = vld [vmem:[#allocation10] ss:$0 sm:$0xff]  ;;  %v1377_v28 = vld [vmem:[#allocation13 + $0x10] sm:$0xff] }
 0x239   :  { %v1138_v3 = vor.u32 %v1358_v0, %v1137_v63  ;;  %v1426_v63 = vld [vmem:[#allocation8] ss:$0 sm:$0xff] }
 0x23a   :  { %v311_v9 = vmul.f32 %v1827_v8, %v1827_v8  ;;  %601 = vmatpush.bf16.msrb.mxu0 %v1142_v2 }
 0x23b   :  { %587 = vmatpush.bf16.msra.mxu3 %v1138_v3 }
 0x23c   :  { %314 = vadd.xlane.f32.xlu1 %v311_v9  ;;  %v1113_v9 = vld [vmem:[#allocation11 + $0x40] sm:$0xf]  ;;  %576 = vmatpush.bf16.msra.mxu2 %v1086_v40 }
 0x23d   :  { %v1114_v11 = vor.u32 %v1353_v5, %v1113_v9  ;;  %v1375_v40 = vld [vmem:[#allocation13] sm:$0xff] }
 0x23e   :  { %602 = vmatpush.bf16.msrb.mxu0 %v1126_v20  ;;  %v1379_v20 = vld [vmem:[#allocation13 + $0x20] sm:$0xff] }
 0x23f   :  { %560 = vmatpush.bf16.msra.mxu1 %v1114_v11  ;;  %588 = vmatpush.bf16.msra.mxu3 %v1122_v17  ;;  %v1382_v11 = vld [vmem:[#allocation13 + $0x38] sm:$0xff]  ;;  %v1404_v17 = vld [vmem:[#allocation13 + $0xe8] sm:$0xff] }
 0x240   :  { %961 = vmatpush.bf16.msrb.mxu2 %v1390_v15 }
 0x242   :  { %603 = vmatpush.bf16.msrb.mxu0 %v1110_v34  ;;  %v1400_v34 = vld [vmem:[#allocation13 + $0xc8] sm:$0xff] }
 0x243   :  { %561 = vmatpush.bf16.msra.mxu1 %v1098_v24  ;;  %589 = vmatpush.bf16.msra.mxu3 %v1106_v29  ;;  %v1378_v24 = vld [vmem:[#allocation13 + $0x18] sm:$0xff]  ;;  %v1401_v29 = vld [vmem:[#allocation13 + $0xd0] sm:$0xff] }
 0x244   :  { %962 = vmatpush.bf16.msrb.mxu2 %v1389_v18 }
 0x246   :  { %604 = vmatpush.bf16.msrb.mxu0 %v1094_v47 }
 0x247   :  { %562 = vmatpush.bf16.msra.mxu1 %v1082_v39  ;;  %590 = vmatpush.bf16.msra.mxu3 %v1090_v44  ;;  %v1384_v44 = vld [vmem:[#allocation13 + $0x48] sm:$0xff] }
 0x248   :  { %963 = vmatpush.bf16.msrb.mxu2 %v1388_v22 }
 0x24a   :  { %989 = vmatpush.bf16.msra.mxu0 %v1406_v13 }
 0x24b   :  { %947 = vmatpush.bf16.msrb.mxu1 %v1382_v11 }
 0x24c   :  { %964 = vmatpush.bf16.msrb.mxu2 %v1387_v26 }
 0x24e   :  { %990 = vmatpush.bf16.msra.mxu0 %v1405_v14 }
 0x250   :  { %965 = vmatpush.bf16.msrb.mxu2 %v1386_v31 }
 0x252   :  { %991 = vmatpush.bf16.msra.mxu0 %v1404_v17 }
 0x254   :  { %966 = vmatpush.bf16.msrb.mxu2 %v1385_v37 }
 0x256   :  { %992 = vmatpush.bf16.msra.mxu0 %v1403_v21 }
 0x258   :  { %967 = vmatpush.bf16.msrb.mxu2 %v1384_v44 }
 0x25a   :  { %993 = vmatpush.bf16.msra.mxu0 %v1402_v25 }
 0x25e   :  { %994 = vmatpush.bf16.msra.mxu0 %v1401_v29 }
 0x262   :  { %995 = vmatpush.bf16.msra.mxu0 %v1400_v34 }
 0x266   :  { %996 = vmatpush.bf16.msra.mxu0 %v1399_v41 }
 0x2a7   :  { %v313_v33 = vpop.xlane.xlu0 %312 }
 0x2a8   :  { %v316_v38 = vmul.f32 %v313_v33, %v1802_v12  ;;  %v1376_v33 = vld [vmem:[#allocation13 + $0x8] sm:$0xff] }
 0x2aa   :  { %v318_v46 = vadd.f32 1e-05, %v316_v38  ;;  %v1393_v38 = vld [vmem:[#allocation13 + $0x90] sm:$0xff] }
 0x2ac   :  { %1435 = vrsqrt.f32 %v318_v46  ;;  %vm326_vm8 = vweird.f32 %v318_v46 }
 0x2af   :  { %v315_v48 = vpop.xlane.xlu1 %314 }
 0x2b0   :  { %v317_v49 = vmul.f32 %v315_v48, %v1802_v12  ;;  %v388_v48 = vperm.slane %v1838_v30, 1 }
 0x2b2   :  { %v1436_v50 = vpop.eup %1435  ;;  %v319_v51 = vadd.f32 1e-05, %v317_v49 }
 0x2b3   :  { %v321_v52 = vmul.f32 %v1436_v50, %v318_v46  ;;  %vm327_vm7 = vweird.f32 %v1436_v50 }
 0x2b4   :  { %1437 = vrsqrt.f32 %v319_v51  ;;  %vm328_vm9 = vmor %vm326_vm8, %vm327_vm7  ;;  %vm336_vm11 = vweird.f32 %v319_v51 }
 0x2b5   :  { %v322_v53 = vmul.f32 %v1436_v50, %v321_v52  ;;  %v1383_v52 = vld [vmem:[#allocation13 + $0x40] sm:$0xff] }
 0x2b6   :  { %968 = vmatpush.bf16.msrb.mxu2 %v1383_v52 }
 0x2b7   :  { %v323_v54 = vmul.f32 0.5, %v322_v53  ;;  %v1391_v53 = vld [vmem:[#allocation13 + $0x80] sm:$0xff] }
 0x2b9   :  { %v324_v55 = vsub.f32 1.5, %v323_v54 }
 0x2ba   :  { %v1438_v56 = vpop.eup %1437 }
 0x2bb   :  { %v325_v57 = vmul.f32 %v1436_v50, %v324_v55  ;;  %v331_v58 = vmul.f32 %v1438_v56, %v319_v51  ;;  %vm337_vm10 = vweird.f32 %v1438_v56 }
 0x2bc   :  { %vm338_vm12 = vmor %vm336_vm11, %vm337_vm10 }
 0x2bd   :  { %v332_v59 = vmul.f32 %v1438_v56, %v331_v58  ;;  %v329_v60 = vsel %vm328_vm9, %v1436_v50, %v325_v57  ;;  %v389_v50 = vperm.slane %v1838_v30, 2 }
 0x2be   :  { %v340_v12 = vmul.f32 %v329_v60, %v1822_v4  ;;  %v1381_v4 = vld [vmem:[#allocation13 + $0x30] sm:$0xff] }
 0x2bf   :  { %v333_v61 = vmul.f32 0.5, %v332_v59  ;;  %948 = vmatpush.bf16.msrb.mxu1 %v1381_v4 }
 0x2c0   :  { %v345_v6 = vmul.f32 %v1426_v63, %v340_v12 }
 0x2c1   :  { %v334_v62 = vsub.f32 1.5, %v333_v61 }
 0x2c2   :  { %v350_v9 = vadd.f32 %v1427_v7, %v345_v6 }
 0x2c3   :  { %v335_v0 = vmul.f32 %v1438_v56, %v334_v62  ;;  %949 = vmatpush.bf16.msrb.mxu1 %v1380_v16 }
 0x2c5   :  { %v339_v1 = vsel %vm338_vm12, %v1438_v56, %v335_v0 }
 0x2c6   :  { %v341_v3 = vmul.f32 %v339_v1, %v1827_v8  ;;  %v1398_v8 = vld [vmem:[#allocation13 + $0xb8] sm:$0xff] }
 0x2c7   :  { %975 = vmatpush.bf16.msrb.mxu3 %v1398_v8  ;;  %950 = vmatpush.bf16.msrb.mxu1 %v1379_v20 }
 0x2c8   :  { %v346_v2 = vmul.f32 %v1426_v63, %v341_v3 }
 0x2ca   :  { %v351_v5 = vadd.f32 %v1427_v7, %v346_v2 }
 0x2cb   :  { %976 = vmatpush.bf16.msrb.mxu3 %v1397_v19  ;;  %951 = vmatpush.bf16.msrb.mxu1 %v1378_v24 }
 0x2cc   :  { %v352_v10 = vpack.c.bf16 %v351_v5, %v350_v9 }
 0x2ce   :  { %563 = vmatmul.bf16.vlgmr.msra.gmra.mxu1 %v352_v10  ;;  %577 = vmatmul.bf16.vlgmr.msra.gmra.mxu2 %v352_v10 }
 0x2cf   :  { %591 = vmatmul.bf16.vlgmr.msra.gmra.mxu3 %v352_v10  ;;  %605 = vmatmul.bf16.vlgmr.msrb.gmra.mxu0 %v352_v10 }
 0x2d0   :  { %977 = vmatpush.bf16.msrb.mxu3 %v1396_v23  ;;  %952 = vmatpush.bf16.msrb.mxu1 %v1377_v28 }
 0x2d4   :  { %978 = vmatpush.bf16.msrb.mxu3 %v1395_v27  ;;  %953 = vmatpush.bf16.msrb.mxu1 %v1376_v33 }
 0x2d8   :  { %979 = vmatpush.bf16.msrb.mxu3 %v1394_v32  ;;  %954 = vmatpush.bf16.msrb.mxu1 %v1375_v40 }
 0x2dc   :  { %980 = vmatpush.bf16.msrb.mxu3 %v1393_v38 }
 0x2e0   :  { %981 = vmatpush.bf16.msrb.mxu3 %v1392_v45 }
 0x2e4   :  { %982 = vmatpush.bf16.msrb.mxu3 %v1391_v53 }
 0x34b   :  { %v564_v39 = vpop.f32.mrf.mxu1 }
 0x34c   :  { %v1842_v42 = vadd.f32 %v564_v39, %v387_v35  ;;  %v606_v43 = vpop.f32.mrf.mxu0 }
 0x34d   :  { %v1844_v46 = vadd.f32 %v606_v43, %v390_v36 }
 0x34e   :  { %v611_v47 = vmul.f32 %v1842_v42, %v1842_v42 }
 0x34f   :  { %v614_v49 = vmul.f32 %v1844_v46, %v1844_v46 }
 0x350   :  { %v619_v51 = vmul.f32 %v611_v47, %v1842_v42 }
 0x351   :  { %v622_v54 = vmul.f32 %v614_v49, %v1844_v46  ;;  %v578_v55 = vpop.f32.mrf.mxu2 }
 0x352   :  { %v627_v56 = vmul.f32 0.044715, %v619_v51  ;;  %v1854_v57 = vadd.f32 %v578_v55, %v388_v48  ;;  %v592_v58 = vpop.f32.mrf.mxu3 }
 0x353   :  { %v630_v59 = vmul.f32 0.044715, %v622_v54  ;;  %v1856_v60 = vadd.f32 %v592_v58, %v389_v50  ;;  %v566_v61 = vpop.f32.mrf.mxu1 }
 0x354   :  { %v635_v62 = vadd.f32 %v627_v56, %v1842_v42  ;;  %v612_v12 = vmul.f32 %v1854_v57, %v1854_v57  ;;  %v1861_v63 = vadd.f32 %v566_v61, %v387_v35  ;;  %v608_v0 = vpop.f32.mrf.mxu0 }
 0x355   :  { %v638_v1 = vadd.f32 %v630_v59, %v1844_v46  ;;  %v613_v3 = vmul.f32 %v1856_v60, %v1856_v60  ;;  %v1866_v6 = vadd.f32 %v608_v0, %v390_v36 }
 0x356   :  { %v643_v7 = vmul.f32 0.7978846, %v635_v62  ;;  %v620_v2 = vmul.f32 %v612_v12, %v1854_v57  ;;  %v615_v9 = vmul.f32 %v1861_v63, %v1861_v63 }
 0x357   :  { %v646_v5 = vmul.f32 0.7978846, %v638_v1  ;;  %v621_v10 = vmul.f32 %v613_v3, %v1856_v60  ;;  %v618_v11 = vmul.f32 %v1866_v6, %v1866_v6 }
 0x358   :  { %v628_v13 = vmul.f32 0.044715, %v620_v2  ;;  %v623_v4 = vmul.f32 %v615_v9, %v1861_v63  ;;  %1439 = vtanh.f32 %v643_v7 }
 0x359   :  { %v629_v14 = vmul.f32 0.044715, %v621_v10  ;;  %v626_v15 = vmul.f32 %v618_v11, %v1866_v6  ;;  %v580_v8 = vpop.f32.mrf.mxu2  ;;  %1441 = vtanh.f32 %v646_v5 }
 0x35a   :  { %v636_v16 = vadd.f32 %v628_v13, %v1854_v57  ;;  %v631_v17 = vmul.f32 0.044715, %v623_v4  ;;  %v581_v18 = vadd.f32 %v580_v8, %v388_v48  ;;  %v594_v19 = vpop.f32.mrf.mxu3 }
 0x35b   :  { %v637_v20 = vadd.f32 %v629_v14, %v1856_v60  ;;  %v634_v21 = vmul.f32 0.044715, %v626_v15  ;;  %v595_v22 = vadd.f32 %v594_v19, %v389_v50 }
 0x35c   :  { %v644_v23 = vmul.f32 0.7978846, %v636_v16  ;;  %v639_v24 = vadd.f32 %v631_v17, %v1861_v63  ;;  %v616_v25 = vmul.f32 %v581_v18, %v581_v18 }
 0x35d   :  { %v645_v26 = vmul.f32 0.7978846, %v637_v20  ;;  %v642_v27 = vadd.f32 %v634_v21, %v1866_v6  ;;  %v617_v28 = vmul.f32 %v595_v22, %v595_v22 }
 0x35e   :  { %1443 = vtanh.f32 %v644_v23  ;;  %v647_v29 = vmul.f32 0.7978846, %v639_v24  ;;  %v624_v30 = vmul.f32 %v616_v25, %v581_v18  ;;  %v1440_v33 = vpop.eup %1439 }
 0x35f   :  { %1445 = vtanh.f32 %v645_v26  ;;  %v650_v31 = vmul.f32 0.7978846, %v642_v27  ;;  %v625_v32 = vmul.f32 %v617_v28, %v595_v22  ;;  %v1442_v35 = vpop.eup %1441  ;;  %v659_v39 = vadd.f32 1.0, %v1440_v33 }
 0x360   :  { %1447 = vtanh.f32 %v647_v29  ;;  %v632_v34 = vmul.f32 0.044715, %v624_v30  ;;  %v662_v41 = vadd.f32 1.0, %v1442_v35 }
 0x361   :  { %1449 = vtanh.f32 %v650_v31  ;;  %v633_v36 = vmul.f32 0.044715, %v625_v32  ;;  %v667_v50 = vmul.f32 0.5, %v659_v39 }
 0x362   :  { %v640_v37 = vadd.f32 %v632_v34, %v581_v18  ;;  %v670_v51 = vmul.f32 0.5, %v662_v41 }
 0x363   :  { %v641_v38 = vadd.f32 %v633_v36, %v595_v22  ;;  %v675_v58 = vmul.f32 %v667_v50, %v1842_v42 }
 0x364   :  { %v1444_v40 = vpop.eup %1443  ;;  %v648_v43 = vmul.f32 0.7978846, %v640_v37  ;;  %v678_v62 = vmul.f32 %v670_v51, %v1844_v46 }
 0x365   :  { %v1446_v44 = vpop.eup %1445  ;;  %v649_v45 = vmul.f32 0.7978846, %v641_v38  ;;  %v660_v54 = vadd.f32 1.0, %v1444_v40 }
 0x366   :  { %v1448_v47 = vpop.eup %1447  ;;  %1451 = vtanh.f32 %v648_v43  ;;  %v661_v56 = vadd.f32 1.0, %v1446_v44 }
 0x367   :  { %v1450_v48 = vpop.eup %1449  ;;  %1453 = vtanh.f32 %v649_v45  ;;  %v663_v49 = vadd.f32 1.0, %v1448_v47  ;;  %v668_v7 = vmul.f32 0.5, %v660_v54 }
 0x368   :  { %v666_v52 = vadd.f32 1.0, %v1450_v48  ;;  %v669_v5 = vmul.f32 0.5, %v661_v56 }
 0x369   :  { %v671_v53 = vmul.f32 0.5, %v663_v49  ;;  %v676_v42 = vmul.f32 %v668_v7, %v1854_v57 }
 0x36a   :  { %v674_v55 = vmul.f32 0.5, %v666_v52 }
 0x36b   :  { %v679_v59 = vmul.f32 %v671_v53, %v1861_v63  ;;  %v677_v63 = vmul.f32 %v669_v5, %v1856_v60  ;;  %v1428_v60 = vld [vmem:[%s1912_s11] ss:$0 sm:$0xff] }
 0x36c   :  { %v1452_v61 = vpop.eup %1451  ;;  %v682_v12 = vmul.f32 %v674_v55, %v1866_v6 }
 0x36d   :  { %v1454_v0 = vpop.eup %1453  ;;  %v683_v1 = vpack.c.bf16 %v679_v59, %v675_v58  ;;  %v664_v3 = vadd.f32 1.0, %v1452_v61 }
 0x36e   :  { %v686_v2 = vpack.c.bf16 %v682_v12, %v678_v62  ;;  %v665_v9 = vadd.f32 1.0, %v1454_v0 }
 0x36f   :  { %955 = vmatmul.bf16.vlgmr.msrb.gmra.mxu1 %v683_v1  ;;  %v672_v10 = vmul.f32 0.5, %v664_v3 }
 0x370   :  { %997 = vmatmul.bf16.vlgmr.msra.gmra.mxu0 %v686_v2  ;;  %v673_v11 = vmul.f32 0.5, %v665_v9 }
 0x371   :  { %v680_v13 = vmul.f32 %v672_v10, %v581_v18 }
 0x372   :  { %v681_v4 = vmul.f32 %v673_v11, %v595_v22 }
 0x373   :  { %v684_v46 = vpack.c.bf16 %v680_v13, %v676_v42 }
 0x374   :  { %v685_v14 = vpack.c.bf16 %v681_v4, %v677_v63 }
 0x375   :  { %969 = vmatmul.bf16.vlgmr.msrb.gmra.mxu2 %v684_v46 }
 0x376   :  { %983 = vmatmul.bf16.vlgmr.msrb.gmra.mxu3 %v685_v14 }
 0x3ec   :  { %v956_v57 = vpop.f32.mrf.mxu1 }
 0x3ed   :  { %v957_v6 = vadd.f32 %v1428_v60, %v956_v57  ;;  %v998_v17 = vpop.f32.mrf.mxu0 }
 0x3f4   :  { %v958_v19 = vpop.f32.mrf.mxu1 }
 0x3f5   :  { %v959_v21 = vadd.f32 %v1428_v60, %v958_v19  ;;  %v1000_v26 = vpop.f32.mrf.mxu0 }
 0x3f8   :  { %v970_v15 = vpop.f32.mrf.mxu2 }
 0x3f9   :  { %v971_v8 = vadd.f32 %v970_v15, %v957_v6  ;;  %v984_v16 = vpop.f32.mrf.mxu3 }
 0x3fb   :  { %v985_v18 = vadd.f32 %v984_v16, %v971_v8 }
 0x3fd   :  { %v999_v20 = vadd.f32 %v998_v17, %v985_v18 }
 0x3ff   :  { %1003 = vst [vmem:[#allocation14] sm:$0xff] %v999_v20 }
 0x400   :  { %v972_v22 = vpop.f32.mrf.mxu2 }
 0x401   :  { %v973_v23 = vadd.f32 %v972_v22, %v959_v21  ;;  %v986_v24 = vpop.f32.mrf.mxu3 }
 0x403   :  { %v987_v25 = vadd.f32 %v986_v24, %v973_v23 }
 0x405   :  { %v1001_v27 = vadd.f32 %v1000_v26, %v987_v25 }
 0x407   :  { %1004 = vst [vmem:[#allocation14 + $0x8] sm:$0xff] %v1001_v27 }
 0x408   :  { %1019 = dma.vmem_to_hbm [thread:$0]  %s1012_s19, 256, %s1014_s1, [#allocation4], %s1684_s16, %s1684_s16, %s1685_s17  }
 0x409   :  { %1679 = dma.done.wait [#allocation4], 256  }
 0x40a   :  { %1680 = vsyncadd [#allocation4], 4294967040 }
 0x40b   :  { %1681 = dma.done.wait [#allocation16], 256  }
 0x40c   :  { %1682 = vsyncadd [#allocation16], 4294967040 }
 0x40d   :  { %1041 = vsyncpa [#allocation3], 1 }
 0x40e   :  { %1042 = vsyncpa [#allocation6], 1 }
 0x40f   :  { %1043 = vsyncpa [#allocation9], 1 }
 0x410   :  { %1044 = vsyncpa [#allocation12], 1 }
 0x411   :  { %1045 = vsyncpa [#allocation4], 1 }
 0x412   :  { %1046 = vsyncpa [#allocation16], 1 }

</bundles_post_ra>
